<compile_context>
chip_gen: v7x
topology: tpu7x:2x2x1
jax: 0.10.0
libtpu: 0.0.40
codegen_flags: <defaults>
</compile_context>

<pallas_src>
import functools

import jax
import jax.numpy as jnp
from jax.experimental import pallas as pl
from jax.experimental.pallas import tpu as pltpu


def _sigmoid(x):
    return 1.0 / (1.0 + jnp.exp(-x))


def gen_kernel(x_ref,
               w1, b1, g1, be1,
               w2, b2, g2, be2,
               w3, b3, g3, be3,
               w4, b4, g4, be4,
               w5, b5,
               o_ref, *, n_valid, eps, compute_dtype):
    """Fused Generator forward.

    x_ref:      (B_pad, z_dim)  bf16/f32 noise tile (whole padded batch)
    wK:         (in_K, out_K)   weights (compute_dtype), resident in VMEM
    bK:         (1, out_K)      Linear bias (f32)
    gK, beK:    (1, out_K)      BatchNorm1d gamma / beta (f32)
    o_ref:      (B_pad, im_dim) f32 generated images in [0, 1]
    """
    bp = o_ref.shape[0]
    inv_n = jnp.float32(1.0 / n_valid)

    if n_valid != bp:
        rows = jax.lax.broadcasted_iota(jnp.int32, (bp, 1), 0)
        valid = (rows < n_valid).astype(jnp.float32)   # mask padded rows
    else:
        valid = None

    h = x_ref[...].astype(compute_dtype)

    for (w, b, g, be) in ((w1, b1, g1, be1),
                          (w2, b2, g2, be2),
                          (w3, b3, g3, be3),
                          (w4, b4, g4, be4)):
        # Linear: bf16 MXU matmul, f32 accumulation, f32 bias.
        z = jnp.dot(h, w[...], preferred_element_type=jnp.float32) + b[...]
        if valid is not None:
            z = z * valid  # keep padded rows out of the batch statistics

        # BatchNorm1d, training-mode forward: biased batch statistics.
        mean = jnp.sum(z, axis=0, keepdims=True) * inv_n
        c = z - mean
        c2 = c * c if valid is None else c * c * valid
        var = jnp.sum(c2, axis=0, keepdims=True) * inv_n
        zn = c * jax.lax.rsqrt(var + eps)

        # Affine + ReLU (f32 epilogue), cast back to bf16 for the next matmul.
        h = jnp.maximum(zn * g[...] + be[...], 0.0).astype(compute_dtype)

    # Final Linear(8*hidden -> im_dim) + Sigmoid; lane-dense (B_pad, im_dim) store.
    logits = jnp.dot(h, w5[...], preferred_element_type=jnp.float32) + b5[...]
    o_ref[...] = _sigmoid(logits).astype(o_ref.dtype)


def generator_forward(noise, params, *, compute_dtype=jnp.bfloat16, eps=1e-5):
    """noise: (B, z_dim) f32 -> (B, im_dim) f32 images in [0, 1]."""
    blocks, (w5, b5) = params[:4], params[4]
    B, _ = noise.shape
    im_dim = w5.shape[1]
    bp = ((B + 7) // 8) * 8  # pad batch to a sublane multiple

    x = noise.astype(compute_dtype)
    if bp != B:
        x = jnp.pad(x, ((0, bp - B), (0, 0)))

    # bf16 weights for the MXU; biases / BN affine params stay f32.
    flat = [x]
    for (w, b, g, be) in blocks:
        flat += [w.astype(compute_dtype), b, g, be]
    flat += [w5.astype(compute_dtype), b5]

    def full_spec(shape):
        nd = len(shape)
        return pl.BlockSpec(shape, lambda i, _nd=nd: (0,) * _nd)

    kernel = functools.partial(gen_kernel, n_valid=B, eps=eps,
                               compute_dtype=compute_dtype)

    out = pl.pallas_call(
        kernel,
        out_shape=jax.ShapeDtypeStruct((bp, im_dim), jnp.float32),
        grid_spec=pl.GridSpec(
            grid=(1,),
            in_specs=[full_spec(a.shape) for a in flat],
            out_specs=full_spec((bp, im_dim)),
        ),
        compiler_params=pltpu.CompilerParams(
            dimension_semantics=("arbitrary",),
        ),
    )(*flat)
    return out[:B]


def init_params(key, z_dim, im_dim, hidden_dim):
    """Mirror PyTorch defaults: Linear U(-1/sqrt(fan_in), 1/sqrt(fan_in)); BN gamma=1, beta=0."""
    dims = [(z_dim, hidden_dim),
            (hidden_dim, 2 * hidden_dim),
            (2 * hidden_dim, 4 * hidden_dim),
            (4 * hidden_dim, 8 * hidden_dim)]
    params = []
    for fan_in, fan_out in dims:
        key, kw, kb = jax.random.split(key, 3)
        bound = 1.0 / jnp.sqrt(jnp.float32(fan_in))
        w = jax.random.uniform(kw, (fan_in, fan_out), jnp.float32, -bound, bound)
        b = jax.random.uniform(kb, (1, fan_out), jnp.float32, -bound, bound)
        gamma = jnp.ones((1, fan_out), jnp.float32)
        beta = jnp.zeros((1, fan_out), jnp.float32)
        params.append((w, b, gamma, beta))
    key, kw, kb = jax.random.split(key, 3)
    fan_in = 8 * hidden_dim
    bound = 1.0 / jnp.sqrt(jnp.float32(fan_in))
    w5 = jax.random.uniform(kw, (fan_in, im_dim), jnp.float32, -bound, bound)
    b5 = jax.random.uniform(kb, (1, im_dim), jnp.float32, -bound, bound)
    params.append((w5, b5))
    return params


def reference_forward(noise, params, *, compute_dtype=jnp.bfloat16, eps=1e-5):
    """Pure-JAX reference of the PyTorch forward (training-mode BatchNorm)."""
    blocks, (w5, b5) = params[:4], params[4]
    h = noise.astype(compute_dtype)
    for (w, b, g, be) in blocks:
        z = jnp.dot(h, w.astype(compute_dtype),
                    preferred_element_type=jnp.float32) + b
        mean = jnp.mean(z, axis=0, keepdims=True)
        var = jnp.mean(jnp.square(z - mean), axis=0, keepdims=True)
        zn = (z - mean) * jax.lax.rsqrt(var + eps)
        h = jnp.maximum(zn * g + be, 0.0).astype(compute_dtype)
    logits = jnp.dot(h, w5.astype(compute_dtype),
                     preferred_element_type=jnp.float32) + b5
    return _sigmoid(logits)


if __name__ == "__main__":
    # Small shapes consistent with the module: z_dim=64, im_dim=256, hidden_dim=32, batch=64.
    z_dim, im_dim, hidden_dim, batch = 64, 256, 32, 64

    key = jax.random.PRNGKey(0)
    key, kx = jax.random.split(key)
    noise = jax.random.normal(kx, (batch, z_dim), jnp.float32)

    params = init_params(key, z_dim, im_dim, hidden_dim)

    out = generator_forward(noise, params)
    out = jax.block_until_ready(out)

    ref = reference_forward(noise, params)
    assert out.shape == (batch, im_dim)
    assert bool(jnp.all(jnp.isfinite(out)))
    assert jnp.allclose(out, ref, atol=3e-3, rtol=3e-3), "mismatch vs reference"

    print("KERNEL_OK")
</pallas_src>

<mosaic_0001>
module attributes {stable_mosaic.version = 11 : i64} {
  func.func @gen_kernel(%arg0: i32, %arg1: memref<64x64xbf16, #tpu.memory_space<vmem>>, %arg2: memref<64x32xbf16, #tpu.memory_space<vmem>>, %arg3: memref<1x32xf32, #tpu.memory_space<vmem>>, %arg4: memref<1x32xf32, #tpu.memory_space<vmem>>, %arg5: memref<1x32xf32, #tpu.memory_space<vmem>>, %arg6: memref<32x64xbf16, #tpu.memory_space<vmem>>, %arg7: memref<1x64xf32, #tpu.memory_space<vmem>>, %arg8: memref<1x64xf32, #tpu.memory_space<vmem>>, %arg9: memref<1x64xf32, #tpu.memory_space<vmem>>, %arg10: memref<64x128xbf16, #tpu.memory_space<vmem>>, %arg11: memref<1x128xf32, #tpu.memory_space<vmem>>, %arg12: memref<1x128xf32, #tpu.memory_space<vmem>>, %arg13: memref<1x128xf32, #tpu.memory_space<vmem>>, %arg14: memref<128x256xbf16, #tpu.memory_space<vmem>>, %arg15: memref<1x256xf32, #tpu.memory_space<vmem>>, %arg16: memref<1x256xf32, #tpu.memory_space<vmem>>, %arg17: memref<1x256xf32, #tpu.memory_space<vmem>>, %arg18: memref<256x256xbf16, #tpu.memory_space<vmem>>, %arg19: memref<1x256xf32, #tpu.memory_space<vmem>>, %arg20: memref<64x256xf32, #tpu.memory_space<vmem>>) attributes {dimension_semantics = [#tpu.dimension_semantics<arbitrary>], iteration_bounds = array<i64: 1>, scalar_prefetch = 0 : i64, scratch_operands = 0 : i64, tpu.core_type = #tpu.core_type<tc>, window_params = [{pipeline_mode = #tpu.pipeline_mode<synchronous>, transform_indices = @transform_0, window_bounds = array<i64: 64, 64>}, {pipeline_mode = #tpu.pipeline_mode<synchronous>, transform_indices = @transform_1, window_bounds = array<i64: 64, 32>}, {pipeline_mode = #tpu.pipeline_mode<synchronous>, transform_indices = @transform_2, window_bounds = array<i64: 1, 32>}, {pipeline_mode = #tpu.pipeline_mode<synchronous>, transform_indices = @transform_3, window_bounds = array<i64: 1, 32>}, {pipeline_mode = #tpu.pipeline_mode<synchronous>, transform_indices = @transform_4, window_bounds = array<i64: 1, 32>}, {pipeline_mode = #tpu.pipeline_mode<synchronous>, transform_indices = @transform_5, window_bounds = array<i64: 32, 64>}, {pipeline_mode = #tpu.pipeline_mode<synchronous>, transform_indices = @transform_6, window_bounds = array<i64: 1, 64>}, {pipeline_mode = #tpu.pipeline_mode<synchronous>, transform_indices = @transform_7, window_bounds = array<i64: 1, 64>}, {pipeline_mode = #tpu.pipeline_mode<synchronous>, transform_indices = @transform_8, window_bounds = array<i64: 1, 64>}, {pipeline_mode = #tpu.pipeline_mode<synchronous>, transform_indices = @transform_9, window_bounds = array<i64: 64, 128>}, {pipeline_mode = #tpu.pipeline_mode<synchronous>, transform_indices = @transform_10, window_bounds = array<i64: 1, 128>}, {pipeline_mode = #tpu.pipeline_mode<synchronous>, transform_indices = @transform_11, window_bounds = array<i64: 1, 128>}, {pipeline_mode = #tpu.pipeline_mode<synchronous>, transform_indices = @transform_12, window_bounds = array<i64: 1, 128>}, {pipeline_mode = #tpu.pipeline_mode<synchronous>, transform_indices = @transform_13, window_bounds = array<i64: 128, 256>}, {pipeline_mode = #tpu.pipeline_mode<synchronous>, transform_indices = @transform_14, window_bounds = array<i64: 1, 256>}, {pipeline_mode = #tpu.pipeline_mode<synchronous>, transform_indices = @transform_15, window_bounds = array<i64: 1, 256>}, {pipeline_mode = #tpu.pipeline_mode<synchronous>, transform_indices = @transform_16, window_bounds = array<i64: 1, 256>}, {pipeline_mode = #tpu.pipeline_mode<synchronous>, transform_indices = @transform_17, window_bounds = array<i64: 256, 256>}, {pipeline_mode = #tpu.pipeline_mode<synchronous>, transform_indices = @transform_18, window_bounds = array<i64: 1, 256>}, {pipeline_mode = #tpu.pipeline_mode<synchronous>, transform_indices = @transform_19, window_bounds = array<i64: 64, 256>}]} {
    %c0 = arith.constant 0 : index
    %c0_0 = arith.constant 0 : index
    %0 = vector.load %arg1[%c0, %c0_0] : memref<64x64xbf16, #tpu.memory_space<vmem>>, vector<64x64xbf16>
    %c0_1 = arith.constant 0 : index
    %c0_2 = arith.constant 0 : index
    %1 = vector.load %arg2[%c0_1, %c0_2] : memref<64x32xbf16, #tpu.memory_space<vmem>>, vector<64x32xbf16>
    %cst = arith.constant dense<0.000000e+00> : vector<64x32xf32>
    %2 = tpu.matmul %0, %1, %cst {dimension_numbers = #tpu.dot_dimension_numbers<[1], [0], [0], [1], [0, 0, 1, 1], [], []>} : vector<64x64xbf16>, vector<64x32xbf16>, vector<64x32xf32> -> vector<64x32xf32>
    %c0_3 = arith.constant 0 : index
    %c0_4 = arith.constant 0 : index
    %3 = vector.load %arg3[%c0_3, %c0_4] : memref<1x32xf32, #tpu.memory_space<vmem>>, vector<1x32xf32>
    %4 = vector.broadcast %3 : vector<1x32xf32> to vector<64x32xf32>
    %5 = arith.addf %2, %4 : vector<64x32xf32>
    %cst_5 = arith.constant dense<0.000000e+00> : vector<32xf32>
    %6 = vector.multi_reduction <add>, %5, %cst_5 [0] : vector<64x32xf32> to vector<32xf32>
    %7 = vector.shape_cast %6 : vector<32xf32> to vector<1x32xf32>
    %cst_6 = arith.constant 1.562500e-02 : f32
    %8 = vector.broadcast %cst_6 : f32 to vector<1x32xf32>
    %9 = arith.mulf %7, %8 : vector<1x32xf32>
    %10 = vector.broadcast %9 : vector<1x32xf32> to vector<64x32xf32>
    %11 = arith.subf %5, %10 : vector<64x32xf32>
    %12 = arith.mulf %11, %11 : vector<64x32xf32>
    %cst_7 = arith.constant dense<0.000000e+00> : vector<32xf32>
    %13 = vector.multi_reduction <add>, %12, %cst_7 [0] : vector<64x32xf32> to vector<32xf32>
    %14 = vector.shape_cast %13 : vector<32xf32> to vector<1x32xf32>
    %cst_8 = arith.constant 1.562500e-02 : f32
    %15 = vector.broadcast %cst_8 : f32 to vector<1x32xf32>
    %16 = arith.mulf %14, %15 : vector<1x32xf32>
    %cst_9 = arith.constant 9.99999974E-6 : f32
    %17 = vector.broadcast %cst_9 : f32 to vector<1x32xf32>
    %18 = arith.addf %16, %17 : vector<1x32xf32>
    %19 = math.rsqrt %18 : vector<1x32xf32>
    %20 = vector.broadcast %19 : vector<1x32xf32> to vector<64x32xf32>
    %21 = arith.mulf %11, %20 : vector<64x32xf32>
    %c0_10 = arith.constant 0 : index
    %c0_11 = arith.constant 0 : index
    %22 = vector.load %arg4[%c0_10, %c0_11] : memref<1x32xf32, #tpu.memory_space<vmem>>, vector<1x32xf32>
    %23 = vector.broadcast %22 : vector<1x32xf32> to vector<64x32xf32>
    %24 = arith.mulf %21, %23 : vector<64x32xf32>
    %c0_12 = arith.constant 0 : index
    %c0_13 = arith.constant 0 : index
    %25 = vector.load %arg5[%c0_12, %c0_13] : memref<1x32xf32, #tpu.memory_space<vmem>>, vector<1x32xf32>
    %26 = vector.broadcast %25 : vector<1x32xf32> to vector<64x32xf32>
    %27 = arith.addf %24, %26 : vector<64x32xf32>
    %cst_14 = arith.constant 0.000000e+00 : f32
    %28 = vector.broadcast %cst_14 : f32 to vector<64x32xf32>
    %29 = arith.maximumf %27, %28 : vector<64x32xf32>
    %30 = arith.truncf %29 : vector<64x32xf32> to vector<64x32xbf16>
    %c0_15 = arith.constant 0 : index
    %c0_16 = arith.constant 0 : index
    %31 = vector.load %arg6[%c0_15, %c0_16] : memref<32x64xbf16, #tpu.memory_space<vmem>>, vector<32x64xbf16>
    %cst_17 = arith.constant dense<0.000000e+00> : vector<64x64xf32>
    %32 = tpu.matmul %30, %31, %cst_17 {dimension_numbers = #tpu.dot_dimension_numbers<[1], [0], [0], [1], [0, 0, 1, 1], [], []>} : vector<64x32xbf16>, vector<32x64xbf16>, vector<64x64xf32> -> vector<64x64xf32>
    %c0_18 = arith.constant 0 : index
    %c0_19 = arith.constant 0 : index
    %33 = vector.load %arg7[%c0_18, %c0_19] : memref<1x64xf32, #tpu.memory_space<vmem>>, vector<1x64xf32>
    %34 = vector.broadcast %33 : vector<1x64xf32> to vector<64x64xf32>
    %35 = arith.addf %32, %34 : vector<64x64xf32>
    %cst_20 = arith.constant dense<0.000000e+00> : vector<64xf32>
    %36 = vector.multi_reduction <add>, %35, %cst_20 [0] : vector<64x64xf32> to vector<64xf32>
    %37 = vector.shape_cast %36 : vector<64xf32> to vector<1x64xf32>
    %cst_21 = arith.constant 1.562500e-02 : f32
    %38 = vector.broadcast %cst_21 : f32 to vector<1x64xf32>
    %39 = arith.mulf %37, %38 : vector<1x64xf32>
    %40 = vector.broadcast %39 : vector<1x64xf32> to vector<64x64xf32>
    %41 = arith.subf %35, %40 : vector<64x64xf32>
    %42 = arith.mulf %41, %41 : vector<64x64xf32>
    %cst_22 = arith.constant dense<0.000000e+00> : vector<64xf32>
    %43 = vector.multi_reduction <add>, %42, %cst_22 [0] : vector<64x64xf32> to vector<64xf32>
    %44 = vector.shape_cast %43 : vector<64xf32> to vector<1x64xf32>
    %cst_23 = arith.constant 1.562500e-02 : f32
    %45 = vector.broadcast %cst_23 : f32 to vector<1x64xf32>
    %46 = arith.mulf %44, %45 : vector<1x64xf32>
    %cst_24 = arith.constant 9.99999974E-6 : f32
    %47 = vector.broadcast %cst_24 : f32 to vector<1x64xf32>
    %48 = arith.addf %46, %47 : vector<1x64xf32>
    %49 = math.rsqrt %48 : vector<1x64xf32>
    %50 = vector.broadcast %49 : vector<1x64xf32> to vector<64x64xf32>
    %51 = arith.mulf %41, %50 : vector<64x64xf32>
    %c0_25 = arith.constant 0 : index
    %c0_26 = arith.constant 0 : index
    %52 = vector.load %arg8[%c0_25, %c0_26] : memref<1x64xf32, #tpu.memory_space<vmem>>, vector<1x64xf32>
    %53 = vector.broadcast %52 : vector<1x64xf32> to vector<64x64xf32>
    %54 = arith.mulf %51, %53 : vector<64x64xf32>
    %c0_27 = arith.constant 0 : index
    %c0_28 = arith.constant 0 : index
    %55 = vector.load %arg9[%c0_27, %c0_28] : memref<1x64xf32, #tpu.memory_space<vmem>>, vector<1x64xf32>
    %56 = vector.broadcast %55 : vector<1x64xf32> to vector<64x64xf32>
    %57 = arith.addf %54, %56 : vector<64x64xf32>
    %cst_29 = arith.constant 0.000000e+00 : f32
    %58 = vector.broadcast %cst_29 : f32 to vector<64x64xf32>
    %59 = arith.maximumf %57, %58 : vector<64x64xf32>
    %60 = arith.truncf %59 : vector<64x64xf32> to vector<64x64xbf16>
    %c0_30 = arith.constant 0 : index
    %c0_31 = arith.constant 0 : index
    %61 = vector.load %arg10[%c0_30, %c0_31] : memref<64x128xbf16, #tpu.memory_space<vmem>>, vector<64x128xbf16>
    %cst_32 = arith.constant dense<0.000000e+00> : vector<64x128xf32>
    %62 = tpu.matmul %60, %61, %cst_32 {dimension_numbers = #tpu.dot_dimension_numbers<[1], [0], [0], [1], [0, 0, 1, 1], [], []>} : vector<64x64xbf16>, vector<64x128xbf16>, vector<64x128xf32> -> vector<64x128xf32>
    %c0_33 = arith.constant 0 : index
    %c0_34 = arith.constant 0 : index
    %63 = vector.load %arg11[%c0_33, %c0_34] : memref<1x128xf32, #tpu.memory_space<vmem>>, vector<1x128xf32>
    %64 = vector.broadcast %63 : vector<1x128xf32> to vector<64x128xf32>
    %65 = arith.addf %62, %64 : vector<64x128xf32>
    %cst_35 = arith.constant dense<0.000000e+00> : vector<128xf32>
    %66 = vector.multi_reduction <add>, %65, %cst_35 [0] : vector<64x128xf32> to vector<128xf32>
    %67 = vector.shape_cast %66 : vector<128xf32> to vector<1x128xf32>
    %cst_36 = arith.constant 1.562500e-02 : f32
    %68 = vector.broadcast %cst_36 : f32 to vector<1x128xf32>
    %69 = arith.mulf %67, %68 : vector<1x128xf32>
    %70 = vector.broadcast %69 : vector<1x128xf32> to vector<64x128xf32>
    %71 = arith.subf %65, %70 : vector<64x128xf32>
    %72 = arith.mulf %71, %71 : vector<64x128xf32>
    %cst_37 = arith.constant dense<0.000000e+00> : vector<128xf32>
    %73 = vector.multi_reduction <add>, %72, %cst_37 [0] : vector<64x128xf32> to vector<128xf32>
    %74 = vector.shape_cast %73 : vector<128xf32> to vector<1x128xf32>
    %cst_38 = arith.constant 1.562500e-02 : f32
    %75 = vector.broadcast %cst_38 : f32 to vector<1x128xf32>
    %76 = arith.mulf %74, %75 : vector<1x128xf32>
    %cst_39 = arith.constant 9.99999974E-6 : f32
    %77 = vector.broadcast %cst_39 : f32 to vector<1x128xf32>
    %78 = arith.addf %76, %77 : vector<1x128xf32>
    %79 = math.rsqrt %78 : vector<1x128xf32>
    %80 = vector.broadcast %79 : vector<1x128xf32> to vector<64x128xf32>
    %81 = arith.mulf %71, %80 : vector<64x128xf32>
    %c0_40 = arith.constant 0 : index
    %c0_41 = arith.constant 0 : index
    %82 = vector.load %arg12[%c0_40, %c0_41] : memref<1x128xf32, #tpu.memory_space<vmem>>, vector<1x128xf32>
    %83 = vector.broadcast %82 : vector<1x128xf32> to vector<64x128xf32>
    %84 = arith.mulf %81, %83 : vector<64x128xf32>
    %c0_42 = arith.constant 0 : index
    %c0_43 = arith.constant 0 : index
    %85 = vector.load %arg13[%c0_42, %c0_43] : memref<1x128xf32, #tpu.memory_space<vmem>>, vector<1x128xf32>
    %86 = vector.broadcast %85 : vector<1x128xf32> to vector<64x128xf32>
    %87 = arith.addf %84, %86 : vector<64x128xf32>
    %cst_44 = arith.constant 0.000000e+00 : f32
    %88 = vector.broadcast %cst_44 : f32 to vector<64x128xf32>
    %89 = arith.maximumf %87, %88 : vector<64x128xf32>
    %90 = arith.truncf %89 : vector<64x128xf32> to vector<64x128xbf16>
    %c0_45 = arith.constant 0 : index
    %c0_46 = arith.constant 0 : index
    %91 = vector.load %arg14[%c0_45, %c0_46] : memref<128x256xbf16, #tpu.memory_space<vmem>>, vector<128x256xbf16>
    %cst_47 = arith.constant dense<0.000000e+00> : vector<64x256xf32>
    %92 = tpu.matmul %90, %91, %cst_47 {dimension_numbers = #tpu.dot_dimension_numbers<[1], [0], [0], [1], [0, 0, 1, 1], [], []>} : vector<64x128xbf16>, vector<128x256xbf16>, vector<64x256xf32> -> vector<64x256xf32>
    %c0_48 = arith.constant 0 : index
    %c0_49 = arith.constant 0 : index
    %93 = vector.load %arg15[%c0_48, %c0_49] : memref<1x256xf32, #tpu.memory_space<vmem>>, vector<1x256xf32>
    %94 = vector.broadcast %93 : vector<1x256xf32> to vector<64x256xf32>
    %95 = arith.addf %92, %94 : vector<64x256xf32>
    %cst_50 = arith.constant dense<0.000000e+00> : vector<256xf32>
    %96 = vector.multi_reduction <add>, %95, %cst_50 [0] : vector<64x256xf32> to vector<256xf32>
    %97 = vector.shape_cast %96 : vector<256xf32> to vector<1x256xf32>
    %cst_51 = arith.constant 1.562500e-02 : f32
    %98 = vector.broadcast %cst_51 : f32 to vector<1x256xf32>
    %99 = arith.mulf %97, %98 : vector<1x256xf32>
    %100 = vector.broadcast %99 : vector<1x256xf32> to vector<64x256xf32>
    %101 = arith.subf %95, %100 : vector<64x256xf32>
    %102 = arith.mulf %101, %101 : vector<64x256xf32>
    %cst_52 = arith.constant dense<0.000000e+00> : vector<256xf32>
    %103 = vector.multi_reduction <add>, %102, %cst_52 [0] : vector<64x256xf32> to vector<256xf32>
    %104 = vector.shape_cast %103 : vector<256xf32> to vector<1x256xf32>
    %cst_53 = arith.constant 1.562500e-02 : f32
    %105 = vector.broadcast %cst_53 : f32 to vector<1x256xf32>
    %106 = arith.mulf %104, %105 : vector<1x256xf32>
    %cst_54 = arith.constant 9.99999974E-6 : f32
    %107 = vector.broadcast %cst_54 : f32 to vector<1x256xf32>
    %108 = arith.addf %106, %107 : vector<1x256xf32>
    %109 = math.rsqrt %108 : vector<1x256xf32>
    %110 = vector.broadcast %109 : vector<1x256xf32> to vector<64x256xf32>
    %111 = arith.mulf %101, %110 : vector<64x256xf32>
    %c0_55 = arith.constant 0 : index
    %c0_56 = arith.constant 0 : index
    %112 = vector.load %arg16[%c0_55, %c0_56] : memref<1x256xf32, #tpu.memory_space<vmem>>, vector<1x256xf32>
    %113 = vector.broadcast %112 : vector<1x256xf32> to vector<64x256xf32>
    %114 = arith.mulf %111, %113 : vector<64x256xf32>
    %c0_57 = arith.constant 0 : index
    %c0_58 = arith.constant 0 : index
    %115 = vector.load %arg17[%c0_57, %c0_58] : memref<1x256xf32, #tpu.memory_space<vmem>>, vector<1x256xf32>
    %116 = vector.broadcast %115 : vector<1x256xf32> to vector<64x256xf32>
    %117 = arith.addf %114, %116 : vector<64x256xf32>
    %cst_59 = arith.constant 0.000000e+00 : f32
    %118 = vector.broadcast %cst_59 : f32 to vector<64x256xf32>
    %119 = arith.maximumf %117, %118 : vector<64x256xf32>
    %120 = arith.truncf %119 : vector<64x256xf32> to vector<64x256xbf16>
    %c0_60 = arith.constant 0 : index
    %c0_61 = arith.constant 0 : index
    %121 = vector.load %arg18[%c0_60, %c0_61] : memref<256x256xbf16, #tpu.memory_space<vmem>>, vector<256x256xbf16>
    %cst_62 = arith.constant dense<0.000000e+00> : vector<64x256xf32>
    %122 = tpu.matmul %120, %121, %cst_62 {dimension_numbers = #tpu.dot_dimension_numbers<[1], [0], [0], [1], [0, 0, 1, 1], [], []>} : vector<64x256xbf16>, vector<256x256xbf16>, vector<64x256xf32> -> vector<64x256xf32>
    %c0_63 = arith.constant 0 : index
    %c0_64 = arith.constant 0 : index
    %123 = vector.load %arg19[%c0_63, %c0_64] : memref<1x256xf32, #tpu.memory_space<vmem>>, vector<1x256xf32>
    %124 = vector.broadcast %123 : vector<1x256xf32> to vector<64x256xf32>
    %125 = arith.addf %122, %124 : vector<64x256xf32>
    %cst_65 = arith.constant 0.000000e+00 : f32
    %126 = vector.broadcast %cst_65 : f32 to vector<64x256xf32>
    %127 = arith.subf %126, %125 : vector<64x256xf32>
    %128 = math.exp %127 : vector<64x256xf32>
    %cst_66 = arith.constant 1.000000e+00 : f32
    %129 = vector.broadcast %cst_66 : f32 to vector<64x256xf32>
    %130 = arith.addf %129, %128 : vector<64x256xf32>
    %cst_67 = arith.constant 1.000000e+00 : f32
    %131 = vector.broadcast %cst_67 : f32 to vector<64x256xf32>
    %132 = arith.divf %131, %130 : vector<64x256xf32>
    %c0_68 = arith.constant 0 : index
    %c0_69 = arith.constant 0 : index
    %133 = vector.load %arg20[%c0_68, %c0_69] : memref<64x256xf32, #tpu.memory_space<vmem>>, vector<64x256xf32>
    tpu.vector_store %arg20[%c0_68, %c0_69], %132 {strides = array<i32>} : memref<64x256xf32, #tpu.memory_space<vmem>>, vector<64x256xf32>,
    return
  }
  func.func @transform_0(%arg0: i32) -> (i32, i32) {
    %c0_i32 = arith.constant 0 : i32
    %c0_i32_0 = arith.constant 0 : i32
    %c0_i32_1 = arith.constant 0 : i32
    return %c0_i32, %c0_i32_0 : i32, i32
  }
  func.func @transform_1(%arg0: i32) -> (i32, i32) {
    %c0_i32 = arith.constant 0 : i32
    %c0_i32_0 = arith.constant 0 : i32
    %c0_i32_1 = arith.constant 0 : i32
    return %c0_i32, %c0_i32_0 : i32, i32
  }
  func.func @transform_2(%arg0: i32) -> (i32, i32) {
    %c0_i32 = arith.constant 0 : i32
    %c0_i32_0 = arith.constant 0 : i32
    %c0_i32_1 = arith.constant 0 : i32
    return %c0_i32, %c0_i32_0 : i32, i32
  }
  func.func @transform_3(%arg0: i32) -> (i32, i32) {
    %c0_i32 = arith.constant 0 : i32
    %c0_i32_0 = arith.constant 0 : i32
    %c0_i32_1 = arith.constant 0 : i32
    return %c0_i32, %c0_i32_0 : i32, i32
  }
  func.func @transform_4(%arg0: i32) -> (i32, i32) {
    %c0_i32 = arith.constant 0 : i32
    %c0_i32_0 = arith.constant 0 : i32
    %c0_i32_1 = arith.constant 0 : i32
    return %c0_i32, %c0_i32_0 : i32, i32
  }
  func.func @transform_5(%arg0: i32) -> (i32, i32) {
    %c0_i32 = arith.constant 0 : i32
    %c0_i32_0 = arith.constant 0 : i32
    %c0_i32_1 = arith.constant 0 : i32
    return %c0_i32, %c0_i32_0 : i32, i32
  }
  func.func @transform_6(%arg0: i32) -> (i32, i32) {
    %c0_i32 = arith.constant 0 : i32
    %c0_i32_0 = arith.constant 0 : i32
    %c0_i32_1 = arith.constant 0 : i32
    return %c0_i32, %c0_i32_0 : i32, i32
  }
  func.func @transform_7(%arg0: i32) -> (i32, i32) {
    %c0_i32 = arith.constant 0 : i32
    %c0_i32_0 = arith.constant 0 : i32
    %c0_i32_1 = arith.constant 0 : i32
    return %c0_i32, %c0_i32_0 : i32, i32
  }
  func.func @transform_8(%arg0: i32) -> (i32, i32) {
    %c0_i32 = arith.constant 0 : i32
    %c0_i32_0 = arith.constant 0 : i32
    %c0_i32_1 = arith.constant 0 : i32
    return %c0_i32, %c0_i32_0 : i32, i32
  }
  func.func @transform_9(%arg0: i32) -> (i32, i32) {
    %c0_i32 = arith.constant 0 : i32
    %c0_i32_0 = arith.constant 0 : i32
    %c0_i32_1 = arith.constant 0 : i32
    return %c0_i32, %c0_i32_0 : i32, i32
  }
  func.func @transform_10(%arg0: i32) -> (i32, i32) {
    %c0_i32 = arith.constant 0 : i32
    %c0_i32_0 = arith.constant 0 : i32
    %c0_i32_1 = arith.constant 0 : i32
    return %c0_i32, %c0_i32_0 : i32, i32
  }
  func.func @transform_11(%arg0: i32) -> (i32, i32) {
    %c0_i32 = arith.constant 0 : i32
    %c0_i32_0 = arith.constant 0 : i32
    %c0_i32_1 = arith.constant 0 : i32
    return %c0_i32, %c0_i32_0 : i32, i32
  }
  func.func @transform_12(%arg0: i32) -> (i32, i32) {
    %c0_i32 = arith.constant 0 : i32
    %c0_i32_0 = arith.constant 0 : i32
    %c0_i32_1 = arith.constant 0 : i32
    return %c0_i32, %c0_i32_0 : i32, i32
  }
  func.func @transform_13(%arg0: i32) -> (i32, i32) {
    %c0_i32 = arith.constant 0 : i32
    %c0_i32_0 = arith.constant 0 : i32
    %c0_i32_1 = arith.constant 0 : i32
    return %c0_i32, %c0_i32_0 : i32, i32
  }
  func.func @transform_14(%arg0: i32) -> (i32, i32) {
    %c0_i32 = arith.constant 0 : i32
    %c0_i32_0 = arith.constant 0 : i32
    %c0_i32_1 = arith.constant 0 : i32
    return %c0_i32, %c0_i32_0 : i32, i32
  }
  func.func @transform_15(%arg0: i32) -> (i32, i32) {
    %c0_i32 = arith.constant 0 : i32
    %c0_i32_0 = arith.constant 0 : i32
    %c0_i32_1 = arith.constant 0 : i32
    return %c0_i32, %c0_i32_0 : i32, i32
  }
  func.func @transform_16(%arg0: i32) -> (i32, i32) {
    %c0_i32 = arith.constant 0 : i32
    %c0_i32_0 = arith.constant 0 : i32
    %c0_i32_1 = arith.constant 0 : i32
    return %c0_i32, %c0_i32_0 : i32, i32
  }
  func.func @transform_17(%arg0: i32) -> (i32, i32) {
    %c0_i32 = arith.constant 0 : i32
    %c0_i32_0 = arith.constant 0 : i32
    %c0_i32_1 = arith.constant 0 : i32
    return %c0_i32, %c0_i32_0 : i32, i32
  }
  func.func @transform_18(%arg0: i32) -> (i32, i32) {
    %c0_i32 = arith.constant 0 : i32
    %c0_i32_0 = arith.constant 0 : i32
    %c0_i32_1 = arith.constant 0 : i32
    return %c0_i32, %c0_i32_0 : i32, i32
  }
  func.func @transform_19(%arg0: i32) -> (i32, i32) {
    %c0_i32 = arith.constant 0 : i32
    %c0_i32_0 = arith.constant 0 : i32
    %c0_i32_1 = arith.constant 0 : i32
    return %c0_i32, %c0_i32_0 : i32, i32
  }
}

</mosaic_0001>

<bundles_post_ra>
// kernel: tpu_custom_call.1
= control target key start
LH: loop header
LB: loop body
LE: loop exit
PB: predicated region body
PF: predicated region fallthrough
CT: control target
= control target key end

     0   :  { %s2606_s0 = inlined_call_operand.vmem [shape: bf16[64,64], index: 0, kind: input, shape index: {}]   ;;  %s2607_s1 = inlined_call_operand.vmem [shape: bf16[64,32], index: 1, kind: input, shape index: {}]   ;;  %s2608_s2 = inlined_call_operand.hbm [shape: f32[1,32], index: 2, kind: input, shape index: {}]   ;;  %s2609_s3 = inlined_call_operand.hbm [shape: f32[1,32], index: 3, kind: input, shape index: {}]   ;;  %s2610_s4 = inlined_call_operand.hbm [shape: f32[1,32], index: 4, kind: input, shape index: {}]   ;;  %s2611_s5 = inlined_call_operand.hbm [shape: bf16[32,64], index: 5, kind: input, shape index: {}]   ;;  %s2612_s6 = inlined_call_operand.hbm [shape: f32[1,64], index: 6, kind: input, shape index: {}]   ;;  %s2613_s7 = inlined_call_operand.vmem [shape: f32[1,64], index: 7, kind: input, shape index: {}]   ;;  %s2614_s8 = inlined_call_operand.vmem [shape: f32[1,64], index: 8, kind: input, shape index: {}]   ;;  %s2615_s9 = inlined_call_operand.vmem [shape: bf16[64,128], index: 9, kind: input, shape index: {}]   ;;  %s2616_s10 = inlined_call_operand.vmem [shape: f32[1,128], index: 10, kind: input, shape index: {}]   ;;  %s2617_s11 = inlined_call_operand.vmem [shape: f32[1,128], index: 11, kind: input, shape index: {}]   ;;  %s2618_s12 = inlined_call_operand.vmem [shape: f32[1,128], index: 12, kind: input, shape index: {}]   ;;  %s2619_s13 = inlined_call_operand.hbm [shape: bf16[128,256], index: 13, kind: input, shape index: {}]   ;;  %s2620_s14 = inlined_call_operand.vmem [shape: f32[1,256], index: 14, kind: input, shape index: {}]   ;;  %s2621_s15 = inlined_call_operand.vmem [shape: f32[1,256], index: 15, kind: input, shape index: {}]   ;;  %s2622_s16 = inlined_call_operand.vmem [shape: f32[1,256], index: 16, kind: input, shape index: {}]   ;;  %s2623_s17 = inlined_call_operand.hbm [shape: bf16[256,256], index: 17, kind: input, shape index: {}]   ;;  %s2624_s18 = inlined_call_operand.vmem [shape: f32[1,256], index: 18, kind: input, shape index: {}]   ;;  %s2625_s19 = inlined_call_operand.hbm [shape: f32[64,256], index: 19, kind: output, shape index: {}]  }
   0x1   :  { %2631 = sst [smem:[#allocation20_spill]] %s2606_s0 }
   0x2   :  { %2632 = sst [smem:[#allocation21_spill]] %s2607_s1 }
   0x3   :  { %2633 = sst [smem:[#allocation22_spill]] %s2608_s2 }
   0x4   :  { %2634 = sst [smem:[#allocation23_spill]] %s2609_s3 }
   0x5   :  { %2635 = sst [smem:[#allocation24_spill]] %s2625_s19 }
   0x6   :  { %24 = vsyncpa [#allocation3], 0 }
   0x7   :  { %25 = vsyncpa [#allocation6], 0 }
   0x8   :  { %26 = vsyncpa [#allocation9], 0 }
   0x9   :  { %27 = vsyncpa [#allocation12], 0 }
   0xa   :  { %28 = vsyncpa [#allocation4], 0  ;;  %s2121_s0 = smov [#allocation5]   ;;  %s2122_s20 = smov [#allocation8]  }
   0xb   :  { %s49_s30 = sshll.u32 %s2121_s0, 4  ;;  %s68_s21 = sshll.u32 %s2122_s20, 4  ;;  %s50_s30 = int_to_ptr.vmem [resolvable:$true] %s49_s30  ;;  %s2236_s21 = int_to_ptr.vmem [resolvable:$true] %s68_s21 }
   0xc   :  { %s2636_s2 = sld [smem:[#allocation23_spill]] }
  0x12   :  { %s1935_s23 = scalar_lea.hbm %s2636_s2, 16 }
  0x13   :  { %p1936_p0 = scmp.ne.s32.totalorder %s2636_s2, %s1935_s23  ;;  %p1939_p1 = scmp.lt.u32.totalorder %s1935_s23, %s2636_s2 }
  0x15   :  { %p1941_p2 = pnand %p1939_p1, %p1936_p0 }
  0x17   :  { %1944 = shalt.err (!%p1941_p2)
}
  0x18   :  { %s1945_s27 = scalar_lea.vmem %s50_s30, 16  ;;  %s1949_s28 = scalar_lea.vmem %s50_s30, 32 }
  0x19   :  { %p1946_p3 = scmp.ne.s32.totalorder %s50_s30, %s1945_s27  ;;  %p1950_p4 = scmp.lt.s32.totalorder %s50_s30, %s50_s30 }
  0x1a   :  { %p1951_p5 = scmp.lt.s32.totalorder %s1949_s28, %s1945_s27 }
  0x1c   :  { %p1952_p6 = por %p1951_p5, %p1950_p4 }
  0x1e   :  { %p1953_p7 = pnand %p1952_p6, %p1946_p3 }
  0x20   :  { %1956 = shalt.err (!%p1953_p7)
}
  0x21   :  { %52 = dma.hbm_to_vmem [thread:$0]  %s2636_s2, 16, %s50_s30, [#allocation6]  }
  0x22   :  { %s1957_s22 = scalar_lea.hbm %s2611_s5, 256 }
  0x23   :  { %p1958_p8 = scmp.ne.s32.totalorder %s2611_s5, %s1957_s22  ;;  %p1961_p9 = scmp.lt.u32.totalorder %s1957_s22, %s2611_s5 }
  0x25   :  { %p1963_p10 = pnand %p1961_p9, %p1958_p8 }
  0x27   :  { %1966 = shalt.err (!%p1963_p10)
}
  0x28   :  { %s1967_s26 = scalar_lea.vmem %s2236_s21, 256  ;;  %p1972_p12 = scmp.lt.s32.totalorder %s2236_s21, %s2236_s21 }
  0x29   :  { %p1968_p11 = scmp.ne.s32.totalorder %s2236_s21, %s1967_s26  ;;  %p1973_p13 = scmp.lt.s32.totalorder %s1967_s26, %s1967_s26 }
  0x2b   :  { %p1974_p0 = por %p1973_p13, %p1972_p12 }
  0x2d   :  { %p1975_p1 = pnand %p1974_p0, %p1968_p11 }
  0x2f   :  { %1978 = shalt.err (!%p1975_p1)
}
  0x30   :  { %s2123_s30 = smov 64   ;;  %s2124_s2 = smov 4  }
  0x31   :  { %74 = dma.hbm_to_vmem [thread:$0]  %s2611_s5, 256, %s2236_s21, [#allocation9], %s2123_s30, %s2123_s30, %s2124_s2  }
  0x32   :  { %s2125_s29 = smov [#allocation11]   ;;  %s1979_s22 = scalar_lea.hbm %s2619_s13, 2048 }
  0x33   :  { %s102_s0 = sshll.u32 %s2125_s29, 4  ;;  %p1980_p2 = scmp.ne.s32.totalorder %s2619_s13, %s1979_s22  ;;  %s103_s0 = int_to_ptr.vmem [resolvable:$true] %s102_s0 }
  0x34   :  { %p1983_p3 = scmp.lt.u32.totalorder %s1979_s22, %s2619_s13 }
  0x36   :  { %p1985_p4 = pnand %p1983_p3, %p1980_p2 }
  0x38   :  { %1988 = shalt.err (!%p1985_p4)
}
  0x39   :  { %s1989_s26 = scalar_lea.vmem %s103_s0, 2048  ;;  %p1994_p6 = scmp.lt.s32.totalorder %s103_s0, %s103_s0 }
  0x3a   :  { %p1990_p5 = scmp.ne.s32.totalorder %s103_s0, %s1989_s26  ;;  %p1995_p7 = scmp.lt.s32.totalorder %s1989_s26, %s1989_s26 }
  0x3c   :  { %p1996_p8 = por %p1995_p7, %p1994_p6 }
  0x3e   :  { %p1997_p9 = pnand %p1996_p8, %p1990_p5 }
  0x40   :  { %2000 = shalt.err (!%p1997_p9)
}
  0x41   :  { %s2126_s5 = smov 128   ;;  %s2127_s21 = smov 8  }
  0x42   :  { %108 = dma.hbm_to_vmem [thread:$0]  %s2619_s13, 2048, %s103_s0, [#allocation12], %s2126_s5, %s2126_s5, %s2127_s21  }
  0x43   :  { %s2128_s27 = smov [#allocation2]   ;;  %s2129_s29 = smov [#allocation7]  }
  0x44   :  { %s39_s28 = sshll.u32 %s2128_s27, 4  ;;  %s59_s20 = sshll.u32 %s2129_s29, 4  ;;  %s40_s28 = int_to_ptr.vmem [resolvable:$true] %s39_s28  ;;  %s60_s20 = int_to_ptr.vmem [resolvable:$true] %s59_s20 }
  0x45   :  { %s2637_s24 = sld [smem:[#allocation22_spill]] }
  0x4b   :  { %s2001_s23 = scalar_lea.hbm %s2637_s24, 16 }
  0x4c   :  { %p2002_p10 = scmp.ne.s32.totalorder %s2637_s24, %s2001_s23  ;;  %p2005_p11 = scmp.lt.u32.totalorder %s2001_s23, %s2637_s24 }
  0x4e   :  { %p2007_p12 = pnand %p2005_p11, %p2002_p10 }
  0x50   :  { %2010 = shalt.err (!%p2007_p12)
}
  0x51   :  { %s2011_s13 = scalar_lea.vmem %s40_s28, 16  ;;  %s2015_s0 = scalar_lea.vmem %s40_s28, 32 }
  0x52   :  { %p2012_p13 = scmp.ne.s32.totalorder %s40_s28, %s2011_s13  ;;  %p2016_p0 = scmp.lt.s32.totalorder %s40_s28, %s40_s28 }
  0x53   :  { %p2017_p1 = scmp.lt.s32.totalorder %s2015_s0, %s2011_s13 }
  0x55   :  { %p2018_p2 = por %p2017_p1, %p2016_p0 }
  0x57   :  { %p2019_p3 = pnand %p2018_p2, %p2012_p13 }
  0x59   :  { %2022 = shalt.err (!%p2019_p3)
}
  0x5a   :  { %42 = dma.hbm_to_vmem [thread:$0]  %s2637_s24, 16, %s40_s28, [#allocation3]  }
  0x5b   :  { %s2023_s19 = scalar_lea.hbm %s2610_s4, 16 }
  0x5c   :  { %p2024_p4 = scmp.ne.s32.totalorder %s2610_s4, %s2023_s19  ;;  %p2027_p5 = scmp.lt.u32.totalorder %s2023_s19, %s2610_s4 }
  0x5e   :  { %p2029_p6 = pnand %p2027_p5, %p2024_p4 }
  0x60   :  { %2032 = shalt.err (!%p2029_p6)
}
  0x61   :  { %s2033_s3 = scalar_lea.vmem %s60_s20, 16  ;;  %s2037_s26 = scalar_lea.vmem %s60_s20, 32 }
  0x62   :  { %p2034_p7 = scmp.ne.s32.totalorder %s60_s20, %s2033_s3  ;;  %p2038_p8 = scmp.lt.s32.totalorder %s60_s20, %s60_s20 }
  0x63   :  { %p2039_p9 = scmp.lt.s32.totalorder %s2037_s26, %s2033_s3 }
  0x65   :  { %p2040_p10 = por %p2039_p9, %p2038_p8 }
  0x67   :  { %p2041_p11 = pnand %p2040_p10, %p2034_p7 }
  0x69   :  { %2044 = shalt.err (!%p2041_p11)
}
  0x6a   :  { %62 = dma.hbm_to_vmem [thread:$0]  %s2610_s4, 16, %s60_s20, [#allocation6]  }
  0x6b   :  { %s2130_s13 = smov [#allocation10]   ;;  %s2131_s30 = smov [#allocation13]  }
  0x6c   :  { %s81_s0 = sshll.u32 %s2130_s13, 4  ;;  %s120_s2 = sshll.u32 %s2131_s30, 4  ;;  %s82_s0 = int_to_ptr.vmem [resolvable:$true] %s81_s0  ;;  %s121_s2 = int_to_ptr.vmem [resolvable:$true] %s120_s2 }
  0x6d   :  { %s2045_s19 = scalar_lea.hbm %s2612_s6, 16 }
  0x6e   :  { %p2046_p12 = scmp.ne.s32.totalorder %s2612_s6, %s2045_s19  ;;  %p2049_p13 = scmp.lt.u32.totalorder %s2045_s19, %s2612_s6 }
  0x70   :  { %p2051_p0 = pnand %p2049_p13, %p2046_p12 }
  0x72   :  { %2054 = shalt.err (!%p2051_p0)
}
  0x73   :  { %s2055_s4 = scalar_lea.vmem %s82_s0, 16  ;;  %s2059_s20 = scalar_lea.vmem %s82_s0, 32 }
  0x74   :  { %p2056_p1 = scmp.ne.s32.totalorder %s82_s0, %s2055_s4  ;;  %p2060_p2 = scmp.lt.s32.totalorder %s82_s0, %s82_s0 }
  0x75   :  { %p2061_p3 = scmp.lt.s32.totalorder %s2059_s20, %s2055_s4 }
  0x77   :  { %p2062_p4 = por %p2061_p3, %p2060_p2 }
  0x79   :  { %p2063_p5 = pnand %p2062_p4, %p2056_p1 }
  0x7b   :  { %2066 = shalt.err (!%p2063_p5)
}
  0x7c   :  { %84 = dma.hbm_to_vmem [thread:$0]  %s2612_s6, 16, %s82_s0, [#allocation9]  }
  0x7d   :  { %s2067_s13 = scalar_lea.hbm %s2623_s17, 4096 }
  0x7e   :  { %p2068_p6 = scmp.ne.s32.totalorder %s2623_s17, %s2067_s13  ;;  %p2071_p7 = scmp.lt.u32.totalorder %s2067_s13, %s2623_s17 }
  0x80   :  { %p2073_p8 = pnand %p2071_p7, %p2068_p6 }
  0x82   :  { %2076 = shalt.err (!%p2073_p8)
}
  0x83   :  { %s2077_s1 = scalar_lea.vmem %s121_s2, 4096  ;;  %p2082_p10 = scmp.lt.s32.totalorder %s121_s2, %s121_s2 }
  0x84   :  { %p2078_p9 = scmp.ne.s32.totalorder %s121_s2, %s2077_s1  ;;  %p2083_p11 = scmp.lt.s32.totalorder %s2077_s1, %s2077_s1 }
  0x86   :  { %p2084_p12 = por %p2083_p11, %p2082_p10 }
  0x88   :  { %p2085_p13 = pnand %p2084_p12, %p2078_p9 }
  0x8a   :  { %2088 = shalt.err (!%p2085_p13)
}
  0x8b   :  { %126 = dma.hbm_to_vmem [thread:$0]  %s2623_s17, 4096, %s121_s2, [#allocation12], %s2126_s5, %s2126_s5, %s2127_s21  }
  0x8c   :  { %2111 = dma.done.wait [#allocation3], 16  }
  0x8d   :  { %2112 = vsyncadd [#allocation3], 4294967280 }
  0x8e   :  { %2113 = dma.done.wait [#allocation6], 32  }
  0x8f   :  { %2114 = vsyncadd [#allocation6], 4294967264 }
  0x90   :  { %2115 = dma.done.wait [#allocation9], 272  }
  0x91   :  { %2116 = vsyncadd [#allocation9], 4294967024 }
  0x92   :  { %2117 = dma.done.wait [#allocation12], 6144  }
  0x93   :  { %2118 = vsyncadd [#allocation12], 4294961152  ;;  %s2638_s25 = sld [smem:[#allocation21_spill]]  ;;  %vm218_vm0 = vcmask 523264   ;;  %s2639_s2 = sld [smem:[#allocation20_spill]]  ;;  %v1783_v8 = vld [vmem:[#allocation8] sm:$0xff]  }
  0x94   :  { %1732 = vmatprep.subr.bf16.mxu1 %v1783_v8  ;;  %v1784_v9 = vld [vmem:[#allocation8 + $0x8] sm:$0xff]   ;;  %v1611_v10 = vld [vmem:[#allocation2] ss:$0 sm:$0xff]  ;;  %vm296_vm1 = vcmask 261120  }
  0x95   :  { %1733 = vmatpush3.bf16.msra.mxu1 %v1783_v8 }
  0x96   :  { %1734 = vmatprep.subr.bf16.mxu1 %v1784_v9 }
  0x99   :  { %v1775_v0 = vld [vmem:[%s2638_s25] sm:$0xff]   ;;  %v1776_v1 = vld [vmem:[%s2638_s25 + $0x8] sm:$0xff]   ;;  %v1777_v2 = vld [vmem:[%s2638_s25 + $0x10] sm:$0xff]   ;;  %1735 = vmatpush3.bf16.msra.mxu1 %v1784_v9 }
  0x9a   :  { %1716 = vmatprep.subr.bf16.mxu0 %v1775_v0  ;;  %v1779_v3 = vld [vmem:[%s2639_s2] sm:$0xff]   ;;  %v1778_v4 = vld [vmem:[%s2638_s25 + $0x18] sm:$0xff]   ;;  %v1780_v5 = vld [vmem:[%s2639_s2 + $0x8] sm:$0xff]  }
  0x9b   :  { %1717 = vmatpush3.bf16.msra.mxu0 %v1775_v0  ;;  %1724 = vmatprep.mubr.msk.bf16.mxu0 %vm218_vm0, %v1779_v3  ;;  %v1781_v6 = vld [vmem:[%s2639_s2 + $0x10] sm:$0xff]   ;;  %v1782_v7 = vld [vmem:[%s2639_s2 + $0x18] sm:$0xff]  }
  0x9c   :  { %1718 = vmatprep.subr.bf16.mxu0 %v1776_v1 }
  0x9f   :  { %1719 = vmatpush3.bf16.msra.mxu0 %v1776_v1 }
  0xa0   :  { %1720 = vmatprep.subr.bf16.mxu0 %v1777_v2 }
  0xa3   :  { %1721 = vmatpush3.bf16.msra.mxu0 %v1777_v2 }
  0xa4   :  { %1722 = vmatprep.subr.bf16.mxu0 %v1778_v4 }
  0xa7   :  { %1723 = vmatpush3.bf16.msra.mxu0 %v1778_v4 }
  0xaa   :  { %1725 = vmatmul.mubr.msk.bf16.vlgmr.msra.gmra.mrb[0].mxu0 %vm218_vm0, %v1780_v5 }
  0xab   :  { %1728 = vmatprep.mubr.msk.bf16.mxu0 %vm218_vm0, %v1781_v6 }
  0xb2   :  { %1729 = vmatmul.mubr.msk.bf16.gmra.mrb[4].mxu0 %vm218_vm0, %v1782_v7 }
 0x17d   :  { %v1726_v11 = vpop.f32.mrb[0].mxu0 }
 0x17e   :  { %v265_v12 = vpop.f32.mrb[1].mxu0  ;;  %v274_v16 = vadd.f32 %v1726_v11, %v1611_v10 }
 0x17f   :  { %v266_v13 = vadd.f32 %v1611_v10, %v265_v12  ;;  %v1727_v14 = vpop.f32.mrb[2].mxu0 }
 0x180   :  { %v268_v15 = vpop.f32.mrb[3].mxu0  ;;  %v277_v19 = vadd.f32 %v1727_v14, %v1611_v10  ;;  %v300_v22 = vsel %vm296_vm1, %v274_v16, 0.0 }
 0x181   :  { %v269_v17 = vadd.f32 %v1611_v10, %v268_v15  ;;  %v297_v18 = vsel %vm296_vm1, %v266_v13, 0.0 }
 0x182   :  { %v302_v26 = vsel %vm296_vm1, %v277_v19, 0.0 }
 0x183   :  { %v298_v20 = vsel %vm296_vm1, %v269_v17, 0.0 }
 0x184   :  { %v299_v21 = vadd.f32 %v298_v20, %v297_v18 }
 0x185   :  { %v1730_v23 = vpop.f32.mrb[4].mxu0 }
 0x186   :  { %v301_v24 = vadd.f32 %v300_v22, %v299_v21  ;;  %v281_v25 = vpop.f32.mrb[5].mxu0  ;;  %v290_v31 = vadd.f32 %v1730_v23, %v1611_v10 }
 0x187   :  { %v282_v27 = vadd.f32 %v1611_v10, %v281_v25  ;;  %v1731_v28 = vpop.f32.mrb[6].mxu0  ;;  %v1624_v25 = vld [vmem:[#allocation5] ss:$0 sm:$0xff] }
 0x188   :  { %v303_v29 = vadd.f32 %v302_v26, %v301_v24  ;;  %v284_v30 = vpop.f32.mrb[7].mxu0  ;;  %v293_v35 = vadd.f32 %v1731_v28, %v1611_v10  ;;  %v308_v38 = vsel %vm296_vm1, %v290_v31, 0.0 }
 0x189   :  { %v304_v32 = vsel %vm296_vm1, %v282_v27, 0.0  ;;  %v285_v33 = vadd.f32 %v1611_v10, %v284_v30  ;;  %v1625_v30 = vld [vmem:[#allocation7] ss:$0 sm:$0xff] }
 0x18a   :  { %v305_v34 = vadd.f32 %v304_v32, %v303_v29  ;;  %v310_v40 = vsel %vm296_vm1, %v293_v35, 0.0 }
 0x18b   :  { %v306_v36 = vsel %vm296_vm1, %v285_v33, 0.0 }
 0x18c   :  { %v307_v37 = vadd.f32 %v306_v36, %v305_v34 }
 0x18e   :  { %v309_v39 = vadd.f32 %v308_v38, %v307_v37 }
 0x190   :  { %v311_v41 = vadd.f32 %v310_v40, %v309_v39 }
 0x192   :  { %v312_v42 = vrot.slane %v311_v41, 4 }
 0x194   :  { %v313_v43 = vadd.f32 %v312_v42, %v311_v41 }
 0x196   :  { %v314_v44 = vrot.slane %v313_v43, 2 }
 0x198   :  { %v315_v45 = vadd.f32 %v314_v44, %v313_v43 }
 0x19a   :  { %v316_v46 = vrot.slane %v315_v45, 1 }
 0x19c   :  { %v317_v47 = vadd.f32 %v316_v46, %v315_v45 }
 0x19e   :  { %v318_v48 = vmul.f32 0.015625, %v317_v47 }
 0x1a0   :  { %v319_v49 = vsub.f32 %v266_v13, %v318_v48  ;;  %v320_v50 = vsub.f32 %v269_v17, %v318_v48  ;;  %v321_v51 = vsub.f32 %v274_v16, %v318_v48  ;;  %v322_v52 = vsub.f32 %v277_v19, %v318_v48 }
 0x1a1   :  { %v323_v53 = vsub.f32 %v282_v27, %v318_v48  ;;  %v324_v54 = vsub.f32 %v285_v33, %v318_v48  ;;  %v325_v55 = vsub.f32 %v290_v31, %v318_v48  ;;  %v326_v56 = vsub.f32 %v293_v35, %v318_v48 }
 0x1a2   :  { %v327_v57 = vmul.f32 %v319_v49, %v319_v49  ;;  %v328_v58 = vmul.f32 %v320_v50, %v320_v50  ;;  %v329_v59 = vmul.f32 %v321_v51, %v321_v51  ;;  %v330_v60 = vmul.f32 %v322_v52, %v322_v52 }
 0x1a3   :  { %v331_v0 = vmul.f32 %v323_v53, %v323_v53  ;;  %v332_v3 = vmul.f32 %v324_v54, %v324_v54  ;;  %v333_v6 = vmul.f32 %v325_v55, %v325_v55  ;;  %v334_v9 = vmul.f32 %v326_v56, %v326_v56 }
 0x1a4   :  { %v335_v61 = vsel %vm296_vm1, %v327_v57, 0.0  ;;  %v336_v62 = vsel %vm296_vm1, %v328_v58, 0.0  ;;  %v338_v1 = vsel %vm296_vm1, %v329_v59, 0.0  ;;  %v340_v4 = vsel %vm296_vm1, %v330_v60, 0.0 }
 0x1a5   :  { %v337_v63 = vadd.f32 %v336_v62, %v335_v61  ;;  %v342_v7 = vsel %vm296_vm1, %v331_v0, 0.0  ;;  %v344_v10 = vsel %vm296_vm1, %v332_v3, 0.0  ;;  %v346_v12 = vsel %vm296_vm1, %v333_v6, 0.0  ;;  %v1786_v0 = vld [vmem:[%s2615_s9 + $0x8] sm:$0xff]   ;;  %v1626_v3 = vld [vmem:[#allocation10] ss:$0 sm:$0xff] }
 0x1a6   :  { %v348_v14 = vsel %vm296_vm1, %v334_v9, 0.0 }
 0x1a7   :  { %v339_v2 = vadd.f32 %v338_v1, %v337_v63  ;;  %v1785_v63 = vld [vmem:[%s2615_s9] sm:$0xff]   ;;  %v1787_v1 = vld [vmem:[%s2615_s9 + $0x10] sm:$0xff]  }
 0x1a8   :  { %1744 = vmatprep.subr.bf16.mxu0 %v1785_v63 }
 0x1a9   :  { %v341_v5 = vadd.f32 %v340_v4, %v339_v2  ;;  %1745 = vmatpush3.bf16.msra.mxu0 %v1785_v63  ;;  %v1788_v2 = vld [vmem:[%s2615_s9 + $0x18] sm:$0xff]  }
 0x1aa   :  { %1746 = vmatprep.subr.bf16.mxu0 %v1786_v0 }
 0x1ab   :  { %v343_v8 = vadd.f32 %v342_v7, %v341_v5 }
 0x1ad   :  { %v345_v11 = vadd.f32 %v344_v10, %v343_v8  ;;  %1747 = vmatpush3.bf16.msra.mxu0 %v1786_v0 }
 0x1ae   :  { %1748 = vmatprep.subr.bf16.mxu0 %v1787_v1 }
 0x1af   :  { %v347_v13 = vadd.f32 %v346_v12, %v345_v11 }
 0x1b1   :  { %v349_v15 = vadd.f32 %v348_v14, %v347_v13  ;;  %1749 = vmatpush3.bf16.msra.mxu0 %v1787_v1 }
 0x1b2   :  { %1750 = vmatprep.subr.bf16.mxu0 %v1788_v2 }
 0x1b3   :  { %v350_v16 = vrot.slane %v349_v15, 4 }
 0x1b5   :  { %v351_v17 = vadd.f32 %v350_v16, %v349_v15  ;;  %1751 = vmatpush3.bf16.msra.mxu0 %v1788_v2 }
 0x1b7   :  { %v352_v18 = vrot.slane %v351_v17, 2 }
 0x1b9   :  { %v353_v19 = vadd.f32 %v352_v18, %v351_v17 }
 0x1bb   :  { %v354_v20 = vrot.slane %v353_v19, 1 }
 0x1bd   :  { %v355_v21 = vadd.f32 %v354_v20, %v353_v19 }
 0x1bf   :  { %v356_v22 = vmul.f32 0.015625, %v355_v21 }
 0x1c1   :  { %v357_v23 = vadd.f32 1e-05, %v356_v22 }
 0x1c3   :  { %1861 = vrsqrt.f32 %v357_v23 }
 0x1cd   :  { %v1862_v24 = vpop.eup %1861 }
 0x1ce   :  { %v364_v26 = vmul.f32 %v1862_v24, %v324_v54  ;;  %v359_v27 = vmul.f32 %v1862_v24, %v319_v49  ;;  %v360_v28 = vmul.f32 %v1862_v24, %v320_v50  ;;  %v361_v29 = vmul.f32 %v1862_v24, %v321_v51 }
 0x1cf   :  { %v362_v31 = vmul.f32 %v1862_v24, %v322_v52  ;;  %v363_v32 = vmul.f32 %v1862_v24, %v323_v53  ;;  %v365_v33 = vmul.f32 %v1862_v24, %v325_v55  ;;  %v366_v34 = vmul.f32 %v1862_v24, %v326_v56 }
 0x1d0   :  { %v379_v35 = vmul.f32 %v1624_v25, %v364_v26  ;;  %v374_v36 = vmul.f32 %v1624_v25, %v359_v27  ;;  %v375_v37 = vmul.f32 %v1624_v25, %v360_v28  ;;  %v376_v38 = vmul.f32 %v1624_v25, %v361_v29 }
 0x1d1   :  { %v377_v39 = vmul.f32 %v1624_v25, %v362_v31  ;;  %v378_v40 = vmul.f32 %v1624_v25, %v363_v32  ;;  %v380_v41 = vmul.f32 %v1624_v25, %v365_v33  ;;  %v381_v42 = vmul.f32 %v1624_v25, %v366_v34 }
 0x1d2   :  { %v394_v43 = vadd.f32 %v1625_v30, %v379_v35  ;;  %v389_v44 = vadd.f32 %v1625_v30, %v374_v36  ;;  %v390_v45 = vadd.f32 %v1625_v30, %v375_v37  ;;  %v391_v46 = vadd.f32 %v1625_v30, %v376_v38 }
 0x1d3   :  { %v392_v47 = vadd.f32 %v1625_v30, %v377_v39  ;;  %v393_v48 = vadd.f32 %v1625_v30, %v378_v40  ;;  %v395_v49 = vadd.f32 %v1625_v30, %v380_v41  ;;  %v396_v50 = vadd.f32 %v1625_v30, %v381_v42 }
 0x1d4   :  { %v402_v51 = vmax.f32 %v394_v43, 0.0  ;;  %v397_v52 = vmax.f32 %v389_v44, 0.0  ;;  %v398_v53 = vmax.f32 %v390_v45, 0.0  ;;  %v399_v54 = vmax.f32 %v391_v46, 0.0 }
 0x1d5   :  { %v400_v55 = vmax.f32 %v392_v47, 0.0  ;;  %v401_v56 = vmax.f32 %v393_v48, 0.0  ;;  %v403_v57 = vmax.f32 %v395_v49, 0.0  ;;  %v404_v58 = vmax.f32 %v396_v50, 0.0 }
 0x1d6   :  { %v405_v59 = vpack.c.bf16 %v398_v53, %v397_v52 }
 0x1d7   :  { %v406_v60 = vpack.c.bf16 %v400_v55, %v399_v54  ;;  %v407_v61 = vpack.c.bf16 %v402_v51, %v401_v56  ;;  %v408_v62 = vpack.c.bf16 %v404_v58, %v403_v57 }
 0x1d8   :  { %1736 = vmatprep.mubr.msk.bf16.mxu1 %vm296_vm1, %v405_v59 }
 0x1d9   :  { %1737 = vmatmul.mubr.msk.bf16.vlgmr.msra.gmra.mrb[0].mxu1 %vm296_vm1, %v406_v60 }
 0x1da   :  { %1740 = vmatprep.mubr.msk.bf16.mxu1 %vm296_vm1, %v407_v61 }
 0x1e1   :  { %1741 = vmatmul.mubr.msk.bf16.gmra.mrb[4].mxu1 %vm296_vm1, %v408_v62 }
 0x2ac   :  { %v1738_v4 = vpop.f32.mrb[0].mxu1 }
 0x2ad   :  { %v478_v5 = vpop.f32.mrb[1].mxu1  ;;  %v487_v9 = vadd.f32 %v1738_v4, %v1626_v3 }
 0x2ae   :  { %v479_v6 = vadd.f32 %v1626_v3, %v478_v5  ;;  %v1739_v7 = vpop.f32.mrb[2].mxu1 }
 0x2af   :  { %v481_v8 = vpop.f32.mrb[3].mxu1  ;;  %v490_v12 = vadd.f32 %v1739_v7, %v1626_v3  ;;  %v512_v15 = vsel %vm218_vm0, %v487_v9, 0.0 }
 0x2b0   :  { %v482_v10 = vadd.f32 %v1626_v3, %v481_v8  ;;  %v509_v11 = vsel %vm218_vm0, %v479_v6, 0.0 }
 0x2b1   :  { %v514_v19 = vsel %vm218_vm0, %v490_v12, 0.0 }
 0x2b2   :  { %v510_v13 = vsel %vm218_vm0, %v482_v10, 0.0 }
 0x2b3   :  { %v511_v14 = vadd.f32 %v510_v13, %v509_v11 }
 0x2b4   :  { %v1742_v16 = vpop.f32.mrb[4].mxu1 }
 0x2b5   :  { %v513_v17 = vadd.f32 %v512_v15, %v511_v14  ;;  %v494_v18 = vpop.f32.mrb[5].mxu1  ;;  %v503_v24 = vadd.f32 %v1742_v16, %v1626_v3 }
 0x2b6   :  { %v495_v20 = vadd.f32 %v1626_v3, %v494_v18  ;;  %v1743_v21 = vpop.f32.mrb[6].mxu1  ;;  %v1633_v18 = vld [vmem:[%s2613_s7] ss:$0 sm:$0xff] }
 0x2b7   :  { %v515_v22 = vadd.f32 %v514_v19, %v513_v17  ;;  %v497_v23 = vpop.f32.mrb[7].mxu1  ;;  %v506_v28 = vadd.f32 %v1743_v21, %v1626_v3  ;;  %v520_v31 = vsel %vm218_vm0, %v503_v24, 0.0 }
 0x2b8   :  { %v516_v25 = vsel %vm218_vm0, %v495_v20, 0.0  ;;  %v498_v26 = vadd.f32 %v1626_v3, %v497_v23  ;;  %v1634_v23 = vld [vmem:[%s2614_s8] ss:$0 sm:$0xff] }
 0x2b9   :  { %v517_v27 = vadd.f32 %v516_v25, %v515_v22  ;;  %v522_v33 = vsel %vm218_vm0, %v506_v28, 0.0 }
 0x2ba   :  { %v518_v29 = vsel %vm218_vm0, %v498_v26, 0.0 }
 0x2bb   :  { %v519_v30 = vadd.f32 %v518_v29, %v517_v27 }
 0x2bd   :  { %v521_v32 = vadd.f32 %v520_v31, %v519_v30 }
 0x2bf   :  { %v523_v34 = vadd.f32 %v522_v33, %v521_v32 }
 0x2c1   :  { %v524_v35 = vrot.slane %v523_v34, 4 }
 0x2c3   :  { %v525_v36 = vadd.f32 %v524_v35, %v523_v34 }
 0x2c5   :  { %v526_v37 = vrot.slane %v525_v36, 2 }
 0x2c7   :  { %v527_v38 = vadd.f32 %v526_v37, %v525_v36 }
 0x2c9   :  { %v528_v39 = vrot.slane %v527_v38, 1 }
 0x2cb   :  { %v529_v40 = vadd.f32 %v528_v39, %v527_v38 }
 0x2cd   :  { %v530_v41 = vmul.f32 0.015625, %v529_v40 }
 0x2cf   :  { %v531_v42 = vsub.f32 %v479_v6, %v530_v41  ;;  %v532_v43 = vsub.f32 %v482_v10, %v530_v41  ;;  %v533_v44 = vsub.f32 %v487_v9, %v530_v41  ;;  %v534_v45 = vsub.f32 %v490_v12, %v530_v41 }
 0x2d0   :  { %v535_v46 = vsub.f32 %v495_v20, %v530_v41  ;;  %v536_v47 = vsub.f32 %v498_v26, %v530_v41  ;;  %v537_v48 = vsub.f32 %v503_v24, %v530_v41  ;;  %v538_v49 = vsub.f32 %v506_v28, %v530_v41 }
 0x2d1   :  { %v539_v50 = vmul.f32 %v531_v42, %v531_v42  ;;  %v540_v51 = vmul.f32 %v532_v43, %v532_v43  ;;  %v541_v52 = vmul.f32 %v533_v44, %v533_v44  ;;  %v542_v53 = vmul.f32 %v534_v45, %v534_v45 }
 0x2d2   :  { %v543_v57 = vmul.f32 %v535_v46, %v535_v46  ;;  %v544_v60 = vmul.f32 %v536_v47, %v536_v47  ;;  %v545_v63 = vmul.f32 %v537_v48, %v537_v48  ;;  %v546_v2 = vmul.f32 %v538_v49, %v538_v49 }
 0x2d3   :  { %v547_v54 = vsel %vm218_vm0, %v539_v50, 0.0  ;;  %v548_v55 = vsel %vm218_vm0, %v540_v51, 0.0  ;;  %v550_v58 = vsel %vm218_vm0, %v541_v52, 0.0  ;;  %v552_v61 = vsel %vm218_vm0, %v542_v53, 0.0 }
 0x2d4   :  { %v549_v56 = vadd.f32 %v548_v55, %v547_v54  ;;  %v554_v0 = vsel %vm218_vm0, %v543_v57, 0.0  ;;  %v556_v3 = vsel %vm218_vm0, %v544_v60, 0.0  ;;  %v558_v5 = vsel %vm218_vm0, %v545_v63, 0.0  ;;  %v1789_v57 = vld [vmem:[#allocation11] ss:$8 sps:$4 sm:$0xff]  }
 0x2d5   :  { %v560_v7 = vsel %vm218_vm0, %v546_v2, 0.0  ;;  %v1797_v60 = vld [vmem:[#allocation11 + $0x24] ss:$8 sps:$4 sm:$0xff]   ;;  %v1798_v63 = vld [vmem:[#allocation11 + $0x30] ss:$8 sps:$4 sm:$0xff]  }
 0x2d6   :  { %v551_v59 = vadd.f32 %v550_v58, %v549_v56  ;;  %v1791_v56 = vld [vmem:[#allocation11 + $0x4] ss:$8 sps:$4 sm:$0xff]   ;;  %v1794_v58 = vld [vmem:[#allocation11 + $0x14] ss:$8 sps:$4 sm:$0xff]  }
 0x2d7   :  { %941 = vmatprep.subr.bf16.mxu0 %v1791_v56  ;;  %v1806_v2 = vld [vmem:[#allocation11 + $0x54] ss:$8 sps:$4 sm:$0xff]  }
 0x2d8   :  { %v553_v62 = vadd.f32 %v552_v61, %v551_v59  ;;  %v1792_v59 = vld [vmem:[#allocation11 + $0x10] ss:$8 sps:$4 sm:$0xff]   ;;  %v1795_v61 = vld [vmem:[#allocation11 + $0x20] ss:$8 sps:$4 sm:$0xff]  }
 0x2da   :  { %v555_v1 = vadd.f32 %v554_v0, %v553_v62  ;;  %v1800_v62 = vld [vmem:[#allocation11 + $0x34] ss:$8 sps:$4 sm:$0xff]   ;;  %v1803_v0 = vld [vmem:[#allocation11 + $0x44] ss:$8 sps:$4 sm:$0xff]  }
 0x2dc   :  { %v557_v4 = vadd.f32 %v556_v3, %v555_v1  ;;  %v1801_v1 = vld [vmem:[#allocation11 + $0x40] ss:$8 sps:$4 sm:$0xff]   ;;  %v1804_v3 = vld [vmem:[#allocation11 + $0x50] ss:$8 sps:$4 sm:$0xff]  }
 0x2de   :  { %v559_v6 = vadd.f32 %v558_v5, %v557_v4  ;;  %v1809_v4 = vld [vmem:[#allocation11 + $0x64] ss:$8 sps:$4 sm:$0xff]   ;;  %v1807_v5 = vld [vmem:[#allocation11 + $0x60] ss:$8 sps:$4 sm:$0xff]  }
 0x2e0   :  { %v561_v8 = vadd.f32 %v560_v7, %v559_v6  ;;  %v1812_v6 = vld [vmem:[#allocation11 + $0x74] ss:$8 sps:$4 sm:$0xff]   ;;  %v1810_v7 = vld [vmem:[#allocation11 + $0x70] ss:$8 sps:$4 sm:$0xff]  }
 0x2e2   :  { %v562_v9 = vrot.slane %v561_v8, 4 }
 0x2e4   :  { %v563_v10 = vadd.f32 %v562_v9, %v561_v8  ;;  %v2132_v8 = vmov 0  }
 0x2e6   :  { %v564_v11 = vrot.slane %v563_v10, 2 }
 0x2e8   :  { %v565_v12 = vadd.f32 %v564_v11, %v563_v10  ;;  %v1635_v10 = vld [vmem:[%s2616_s10] ss:$0 sm:$0xff] }
 0x2ea   :  { %v566_v13 = vrot.slane %v565_v12, 1 }
 0x2ec   :  { %v567_v14 = vadd.f32 %v566_v13, %v565_v12 }
 0x2ee   :  { %v568_v15 = vmul.f32 0.015625, %v567_v14 }
 0x2f0   :  { %v569_v16 = vadd.f32 1e-05, %v568_v15 }
 0x2f2   :  { %1863 = vrsqrt.f32 %v569_v16 }
 0x2fc   :  { %v1864_v17 = vpop.eup %1863 }
 0x2fd   :  { %v573_v19 = vmul.f32 %v1864_v17, %v533_v44  ;;  %v574_v20 = vmul.f32 %v1864_v17, %v534_v45  ;;  %v576_v21 = vmul.f32 %v1864_v17, %v536_v47  ;;  %v571_v22 = vmul.f32 %v1864_v17, %v531_v42 }
 0x2fe   :  { %v572_v24 = vmul.f32 %v1864_v17, %v532_v43  ;;  %v575_v25 = vmul.f32 %v1864_v17, %v535_v46  ;;  %v577_v26 = vmul.f32 %v1864_v17, %v537_v48  ;;  %v578_v27 = vmul.f32 %v1864_v17, %v538_v49 }
 0x2ff   :  { %v589_v28 = vmul.f32 %v1633_v18, %v574_v20  ;;  %v591_v29 = vmul.f32 %v1633_v18, %v576_v21  ;;  %v586_v30 = vmul.f32 %v1633_v18, %v571_v22  ;;  %v588_v31 = vmul.f32 %v1633_v18, %v573_v19 }
 0x300   :  { %v587_v32 = vmul.f32 %v1633_v18, %v572_v24  ;;  %v590_v33 = vmul.f32 %v1633_v18, %v575_v25  ;;  %v592_v34 = vmul.f32 %v1633_v18, %v577_v26  ;;  %v593_v35 = vmul.f32 %v1633_v18, %v578_v27 }
 0x301   :  { %v606_v36 = vadd.f32 %v1634_v23, %v591_v29  ;;  %v601_v37 = vadd.f32 %v1634_v23, %v586_v30  ;;  %v603_v38 = vadd.f32 %v1634_v23, %v588_v31  ;;  %v604_v39 = vadd.f32 %v1634_v23, %v589_v28 }
 0x302   :  { %v602_v40 = vadd.f32 %v1634_v23, %v587_v32  ;;  %v605_v41 = vadd.f32 %v1634_v23, %v590_v33  ;;  %v607_v42 = vadd.f32 %v1634_v23, %v592_v34  ;;  %v608_v44 = vadd.f32 %v1634_v23, %v593_v35 }
 0x303   :  { %v614_v43 = vmax.f32 %v606_v36, 0.0  ;;  %v609_v45 = vmax.f32 %v601_v37, 0.0  ;;  %v611_v46 = vmax.f32 %v603_v38, 0.0  ;;  %v612_v47 = vmax.f32 %v604_v39, 0.0 }
 0x304   :  { %v610_v48 = vmax.f32 %v602_v40, 0.0  ;;  %v613_v49 = vmax.f32 %v605_v41, 0.0  ;;  %v615_v50 = vmax.f32 %v607_v42, 0.0  ;;  %v616_v51 = vmax.f32 %v608_v44, 0.0 }
 0x305   :  { %v618_v52 = vpack.c.bf16 %v612_v47, %v611_v46 }
 0x306   :  { %v617_v53 = vpack.c.bf16 %v610_v48, %v609_v45  ;;  %v619_v54 = vpack.c.bf16 %v614_v43, %v613_v49  ;;  %v620_v55 = vpack.c.bf16 %v616_v51, %v615_v50 }
 0x308   :  { %1752 = vmatprep.mubr.msk.bf16.mxu0 %vm218_vm0, %v617_v53 }
 0x309   :  { %1753 = vmatmul.mubr.msk.bf16.vlgmr.msra.gmra.mrb[8].mxu0 %vm218_vm0, %v618_v52 }
 0x30a   :  { %1756 = vmatprep.mubr.msk.bf16.mxu0 %vm218_vm0, %v619_v54  ;;  %942 = vmatpush1.bf16.msra.mxu0 %v1789_v57 }
 0x30b   :  { %943 = vmatprep.subr.bf16.mxu0 %v1794_v58 }
 0x30e   :  { %944 = vmatpush1.bf16.msra.mxu0 %v1792_v59 }
 0x30f   :  { %945 = vmatprep.subr.bf16.mxu0 %v1797_v60 }
 0x311   :  { %1757 = vmatmul.mubr.msk.bf16.gmra.mrb[12].mxu0 %vm218_vm0, %v620_v55 }
 0x312   :  { %946 = vmatpush1.bf16.msra.mxu0 %v1795_v61  ;;  %973 = vmatprep.mubr.bf16.mxu0 %v2132_v8 }
 0x313   :  { %947 = vmatprep.subr.bf16.mxu0 %v1800_v62 }
 0x316   :  { %948 = vmatpush1.bf16.msra.mxu0 %v1798_v63 }
 0x317   :  { %949 = vmatprep.subr.bf16.mxu0 %v1803_v0 }
 0x31a   :  { %950 = vmatpush1.bf16.msra.mxu0 %v1801_v1 }
 0x31b   :  { %951 = vmatprep.subr.bf16.mxu0 %v1806_v2 }
 0x31e   :  { %952 = vmatpush1.bf16.msra.mxu0 %v1804_v3 }
 0x31f   :  { %953 = vmatprep.subr.bf16.mxu0 %v1809_v4 }
 0x322   :  { %954 = vmatpush1.bf16.msra.mxu0 %v1807_v5 }
 0x323   :  { %955 = vmatprep.subr.bf16.mxu0 %v1812_v6 }
 0x326   :  { %956 = vmatpush1.bf16.msra.mxu0 %v1810_v7 }
 0x3dc   :  { %v1754_v9 = vpop.f32.mrb[8].mxu0 }
 0x3dd   :  { %v706_v11 = vpop.f32.mrb[9].mxu0  ;;  %v715_v16 = vadd.f32 %v1754_v9, %v1635_v10  ;;  %v1644_v9 = vld [vmem:[%s2617_s11] ss:$0 sm:$0xff] }
 0x3de   :  { %v1755_v12 = vpop.f32.mrb[10].mxu0  ;;  %v707_v14 = vadd.f32 %v1635_v10, %v706_v11 }
 0x3df   :  { %v709_v13 = vpop.f32.mrb[11].mxu0  ;;  %v718_v18 = vadd.f32 %v1755_v12, %v1635_v10 }
 0x3e0   :  { %v710_v15 = vadd.f32 %v1635_v10, %v709_v13 }
 0x3e2   :  { %v737_v17 = vadd.f32 %v710_v15, %v707_v14 }
 0x3e4   :  { %v738_v19 = vadd.f32 %v737_v17, %v715_v16  ;;  %v1758_v20 = vpop.f32.mrb[12].mxu0 }
 0x3e5   :  { %v722_v21 = vpop.f32.mrb[13].mxu0  ;;  %v731_v28 = vadd.f32 %v1758_v20, %v1635_v10 }
 0x3e6   :  { %v723_v22 = vadd.f32 %v1635_v10, %v722_v21  ;;  %v739_v23 = vadd.f32 %v738_v19, %v718_v18  ;;  %v1759_v24 = vpop.f32.mrb[14].mxu0 }
 0x3e7   :  { %v725_v25 = vpop.f32.mrb[15].mxu0  ;;  %v734_v30 = vadd.f32 %v1759_v24, %v1635_v10 }
 0x3e8   :  { %v740_v26 = vadd.f32 %v739_v23, %v723_v22  ;;  %v726_v27 = vadd.f32 %v1635_v10, %v725_v25 }
 0x3ea   :  { %v741_v29 = vadd.f32 %v740_v26, %v726_v27 }
 0x3ec   :  { %v742_v31 = vadd.f32 %v741_v29, %v731_v28 }
 0x3ee   :  { %v743_v32 = vadd.f32 %v742_v31, %v734_v30 }
 0x3f0   :  { %v744_v33 = vrot.slane %v743_v32, 4 }
 0x3f2   :  { %v745_v34 = vadd.f32 %v744_v33, %v743_v32 }
 0x3f4   :  { %v746_v35 = vrot.slane %v745_v34, 2 }
 0x3f6   :  { %v747_v36 = vadd.f32 %v746_v35, %v745_v34 }
 0x3f8   :  { %v748_v37 = vrot.slane %v747_v36, 1 }
 0x3fa   :  { %v749_v38 = vadd.f32 %v748_v37, %v747_v36 }
 0x3fc   :  { %v750_v39 = vmul.f32 0.015625, %v749_v38 }
 0x3fe   :  { %v751_v40 = vsub.f32 %v707_v14, %v750_v39  ;;  %v752_v41 = vsub.f32 %v710_v15, %v750_v39  ;;  %v753_v42 = vsub.f32 %v715_v16, %v750_v39  ;;  %v754_v44 = vsub.f32 %v718_v18, %v750_v39  ;;  %v1645_v14 = vld [vmem:[%s2618_s12] ss:$0 sm:$0xff] }
 0x3ff   :  { %v755_v43 = vsub.f32 %v723_v22, %v750_v39  ;;  %v756_v45 = vsub.f32 %v726_v27, %v750_v39  ;;  %v757_v46 = vsub.f32 %v731_v28, %v750_v39  ;;  %v758_v47 = vsub.f32 %v734_v30, %v750_v39 }
 0x400   :  { %v759_v48 = vmul.f32 %v751_v40, %v751_v40  ;;  %v760_v49 = vmul.f32 %v752_v41, %v752_v41  ;;  %v761_v50 = vmul.f32 %v753_v42, %v753_v42  ;;  %v762_v52 = vmul.f32 %v754_v44, %v754_v44 }
 0x401   :  { %v763_v54 = vmul.f32 %v755_v43, %v755_v43  ;;  %v764_v56 = vmul.f32 %v756_v45, %v756_v45  ;;  %v765_v58 = vmul.f32 %v757_v46, %v757_v46  ;;  %v766_v60 = vmul.f32 %v758_v47, %v758_v47 }
 0x402   :  { %v767_v51 = vadd.f32 %v760_v49, %v759_v48  ;;  %v1813_v48 = vld [vmem:[#allocation13] ss:$8 sps:$4 sm:$0xff]   ;;  %v1818_v49 = vld [vmem:[#allocation13 + $0x14] ss:$8 sps:$4 sm:$0xff]  }
 0x404   :  { %v768_v53 = vadd.f32 %v767_v51, %v761_v50  ;;  %v1816_v50 = vld [vmem:[#allocation13 + $0x10] ss:$8 sps:$4 sm:$0xff]   ;;  %v1821_v51 = vld [vmem:[#allocation13 + $0x24] ss:$8 sps:$4 sm:$0xff]  }
 0x406   :  { %v769_v55 = vadd.f32 %v768_v53, %v762_v52  ;;  %v1819_v52 = vld [vmem:[#allocation13 + $0x20] ss:$8 sps:$4 sm:$0xff]   ;;  %v1824_v53 = vld [vmem:[#allocation13 + $0x34] ss:$8 sps:$4 sm:$0xff]  }
 0x408   :  { %v770_v57 = vadd.f32 %v769_v55, %v763_v54  ;;  %v1822_v54 = vld [vmem:[#allocation13 + $0x30] ss:$8 sps:$4 sm:$0xff]   ;;  %v1827_v55 = vld [vmem:[#allocation13 + $0x44] ss:$8 sps:$4 sm:$0xff]  }
 0x40a   :  { %v771_v59 = vadd.f32 %v770_v57, %v764_v56  ;;  %v1825_v56 = vld [vmem:[#allocation13 + $0x40] ss:$8 sps:$4 sm:$0xff]   ;;  %v1828_v57 = vld [vmem:[#allocation13 + $0x50] ss:$8 sps:$4 sm:$0xff]  }
 0x40c   :  { %v772_v61 = vadd.f32 %v771_v59, %v765_v58  ;;  %v1833_v58 = vld [vmem:[#allocation13 + $0x64] ss:$8 sps:$4 sm:$0xff]   ;;  %v1831_v59 = vld [vmem:[#allocation13 + $0x60] ss:$8 sps:$4 sm:$0xff]  }
 0x40e   :  { %v773_v62 = vadd.f32 %v772_v61, %v766_v60  ;;  %v1836_v60 = vld [vmem:[#allocation13 + $0x74] ss:$8 sps:$4 sm:$0xff]   ;;  %v1834_v61 = vld [vmem:[#allocation13 + $0x70] ss:$8 sps:$4 sm:$0xff]  }
 0x410   :  { %v774_v63 = vrot.slane %v773_v62, 4 }
 0x412   :  { %v775_v0 = vadd.f32 %v774_v63, %v773_v62  ;;  %v1839_v62 = vld [vmem:[#allocation13 + $0x84] ss:$8 sps:$4 sm:$0xff]   ;;  %v1837_v63 = vld [vmem:[#allocation13 + $0x80] ss:$8 sps:$4 sm:$0xff]  }
 0x414   :  { %v776_v1 = vrot.slane %v775_v0, 2 }
 0x416   :  { %v777_v2 = vadd.f32 %v776_v1, %v775_v0  ;;  %v1842_v0 = vld [vmem:[#allocation13 + $0x94] ss:$8 sps:$4 sm:$0xff]   ;;  %v1840_v1 = vld [vmem:[#allocation13 + $0x90] ss:$8 sps:$4 sm:$0xff]  }
 0x418   :  { %v778_v3 = vrot.slane %v777_v2, 1 }
 0x41a   :  { %v779_v4 = vadd.f32 %v778_v3, %v777_v2  ;;  %v1845_v2 = vld [vmem:[#allocation13 + $0xa4] ss:$8 sps:$4 sm:$0xff]   ;;  %v1843_v3 = vld [vmem:[#allocation13 + $0xa0] ss:$8 sps:$4 sm:$0xff]  }
 0x41c   :  { %v780_v5 = vmul.f32 0.015625, %v779_v4  ;;  %v1848_v4 = vld [vmem:[#allocation13 + $0xb4] ss:$8 sps:$4 sm:$0xff]  }
 0x41e   :  { %v781_v6 = vadd.f32 1e-05, %v780_v5  ;;  %v1846_v5 = vld [vmem:[#allocation13 + $0xb0] ss:$8 sps:$4 sm:$0xff]  }
 0x420   :  { %1865 = vrsqrt.f32 %v781_v6  ;;  %v1851_v6 = vld [vmem:[#allocation13 + $0xc4] ss:$8 sps:$4 sm:$0xff]  }
 0x42a   :  { %v1866_v7 = vpop.eup %1865 }
 0x42b   :  { %v788_v10 = vmul.f32 %v1866_v7, %v756_v45  ;;  %v783_v11 = vmul.f32 %v1866_v7, %v751_v40  ;;  %v784_v12 = vmul.f32 %v1866_v7, %v752_v41  ;;  %v785_v13 = vmul.f32 %v1866_v7, %v753_v42 }
 0x42c   :  { %v786_v15 = vmul.f32 %v1866_v7, %v754_v44  ;;  %v787_v16 = vmul.f32 %v1866_v7, %v755_v43  ;;  %v789_v17 = vmul.f32 %v1866_v7, %v757_v46  ;;  %v790_v18 = vmul.f32 %v1866_v7, %v758_v47  ;;  %v1815_v47 = vld [vmem:[#allocation13 + $0x4] ss:$8 sps:$4 sm:$0xff]   ;;  %v1849_v7 = vld [vmem:[#allocation13 + $0xc0] ss:$8 sps:$4 sm:$0xff]  }
 0x42d   :  { %v803_v19 = vmul.f32 %v1644_v9, %v788_v10  ;;  %v798_v20 = vmul.f32 %v1644_v9, %v783_v11  ;;  %v799_v21 = vmul.f32 %v1644_v9, %v784_v12  ;;  %v800_v22 = vmul.f32 %v1644_v9, %v785_v13  ;;  %1406 = vmatprep.subr.bf16.mxu1 %v1815_v47  ;;  %v1852_v10 = vld [vmem:[#allocation13 + $0xd0] ss:$8 sps:$4 sm:$0xff]   ;;  %v1855_v11 = vld [vmem:[#allocation13 + $0xe0] ss:$8 sps:$4 sm:$0xff]   ;;  %v1857_v12 = vld [vmem:[#allocation13 + $0xe4] ss:$8 sps:$4 sm:$0xff]  }
 0x42e   :  { %v801_v23 = vmul.f32 %v1644_v9, %v786_v15  ;;  %v802_v24 = vmul.f32 %v1644_v9, %v787_v16  ;;  %v804_v25 = vmul.f32 %v1644_v9, %v789_v17  ;;  %v805_v26 = vmul.f32 %v1644_v9, %v790_v18  ;;  %1407 = vmatpush1.bf16.msra.mxu1 %v1813_v48  ;;  %v1854_v9 = vld [vmem:[#allocation13 + $0xd4] ss:$8 sps:$4 sm:$0xff]   ;;  %v849_v18 = vld [vmem:[%s2620_s14] sm:$0x3] }
 0x42f   :  { %v813_v27 = vadd.f32 %v1645_v14, %v798_v20  ;;  %v814_v28 = vadd.f32 %v1645_v14, %v799_v21  ;;  %v815_v29 = vadd.f32 %v1645_v14, %v800_v22  ;;  %v818_v30 = vadd.f32 %v1645_v14, %v803_v19  ;;  %1408 = vmatprep.subr.bf16.mxu1 %v1818_v49  ;;  %v1860_v13 = vld [vmem:[#allocation13 + $0xf4] ss:$8 sps:$4 sm:$0xff]  }
 0x430   :  { %v816_v31 = vadd.f32 %v1645_v14, %v801_v23  ;;  %v817_v32 = vadd.f32 %v1645_v14, %v802_v24  ;;  %v819_v33 = vadd.f32 %v1645_v14, %v804_v25  ;;  %v820_v34 = vadd.f32 %v1645_v14, %v805_v26  ;;  %v1858_v14 = vld [vmem:[#allocation13 + $0xf0] ss:$8 sps:$4 sm:$0xff]  }
 0x431   :  { %v821_v35 = vmax.f32 %v813_v27, 0.0  ;;  %v822_v36 = vmax.f32 %v814_v28, 0.0  ;;  %v823_v37 = vmax.f32 %v815_v29, 0.0  ;;  %v826_v38 = vmax.f32 %v818_v30, 0.0 }
 0x432   :  { %v824_v39 = vmax.f32 %v816_v31, 0.0  ;;  %v825_v40 = vmax.f32 %v817_v32, 0.0  ;;  %v827_v41 = vmax.f32 %v819_v33, 0.0  ;;  %v828_v42 = vmax.f32 %v820_v34, 0.0  ;;  %1409 = vmatpush1.bf16.msra.mxu1 %v1816_v50 }
 0x433   :  { %v829_v44 = vpack.c.bf16 %v822_v36, %v821_v35  ;;  %1410 = vmatprep.subr.bf16.mxu1 %v1821_v51  ;;  %v851_v15 = vlaneseq }
 0x434   :  { %v830_v43 = vpack.c.bf16 %v824_v39, %v823_v37  ;;  %v831_v45 = vpack.c.bf16 %v826_v38, %v825_v40  ;;  %v832_v46 = vpack.c.bf16 %v828_v42, %v827_v41 }
 0x435   :  { %974 = vmatmul.mubr.bf16.vlgmr.msra.gmra.mrb[16].mxu0 %v829_v44  ;;  %v852_v16 = vshrl.u32 %v851_v15, 7 }
 0x436   :  { %983 = vmatprep.mubr.bf16.mxu0 %v2132_v8  ;;  %1411 = vmatpush1.bf16.msra.mxu1 %v1819_v52 }
 0x437   :  { %1412 = vmatprep.subr.bf16.mxu1 %v1824_v53  ;;  %v2432_v17 = vsub.s32 0, %v852_v16  ;;  %v2437_v19 = vsub.s32 1, %v852_v16 }
 0x439   :  { %v854_v20 = vrot.slane %v849_v18, %v2432_v17  ;;  %v858_v22 = vrot.slane %v849_v18, %v2437_v19 }
 0x43a   :  { %1413 = vmatpush1.bf16.msra.mxu1 %v1822_v54 }
 0x43b   :  { %1414 = vmatprep.subr.bf16.mxu1 %v1827_v55 }
 0x43d   :  { %984 = vmatmul.mubr.bf16.gmra.mrb[20].mxu0 %v830_v43 }
 0x43e   :  { %993 = vmatprep.mubr.bf16.mxu0 %v2132_v8  ;;  %1415 = vmatpush1.bf16.msra.mxu1 %v1825_v56 }
 0x445   :  { %994 = vmatmul.mubr.bf16.gmra.mrb[24].mxu0 %v831_v45 }
 0x446   :  { %1003 = vmatprep.mubr.bf16.mxu0 %v2132_v8  ;;  %v1830_v8 = vld [vmem:[#allocation13 + $0x54] ss:$8 sps:$4 sm:$0xff]  }
 0x447   :  { %1416 = vmatprep.subr.bf16.mxu1 %v1830_v8 }
 0x448   :  { %1417 = vmatpush1.bf16.msra.mxu1 %v1828_v57 }
 0x449   :  { %1418 = vmatprep.subr.bf16.mxu1 %v1833_v58 }
 0x44c   :  { %1419 = vmatpush1.bf16.msra.mxu1 %v1831_v59 }
 0x44d   :  { %1004 = vmatmul.mubr.bf16.gmra.mrb[28].mxu0 %v832_v46  ;;  %1420 = vmatprep.subr.bf16.mxu1 %v1836_v60 }
 0x450   :  { %1421 = vmatpush1.bf16.msra.mxu1 %v1834_v61 }
 0x451   :  { %1422 = vmatprep.subr.bf16.mxu1 %v1839_v62 }
 0x454   :  { %1423 = vmatpush1.bf16.msra.mxu1 %v1837_v63 }
 0x455   :  { %1424 = vmatprep.subr.bf16.mxu1 %v1842_v0 }
 0x458   :  { %1425 = vmatpush1.bf16.msra.mxu1 %v1840_v1 }
 0x459   :  { %1426 = vmatprep.subr.bf16.mxu1 %v1845_v2 }
 0x45c   :  { %1427 = vmatpush1.bf16.msra.mxu1 %v1843_v3 }
 0x45d   :  { %1428 = vmatprep.subr.bf16.mxu1 %v1848_v4 }
 0x460   :  { %1429 = vmatpush1.bf16.msra.mxu1 %v1846_v5 }
 0x461   :  { %1430 = vmatprep.subr.bf16.mxu1 %v1851_v6 }
 0x464   :  { %1431 = vmatpush1.bf16.msra.mxu1 %v1849_v7 }
 0x465   :  { %1432 = vmatprep.subr.bf16.mxu1 %v1854_v9 }
 0x468   :  { %1433 = vmatpush1.bf16.msra.mxu1 %v1852_v10 }
 0x469   :  { %1434 = vmatprep.subr.bf16.mxu1 %v1857_v12 }
 0x46c   :  { %1435 = vmatpush1.bf16.msra.mxu1 %v1855_v11 }
 0x46d   :  { %1436 = vmatprep.subr.bf16.mxu1 %v1860_v13 }
 0x470   :  { %1437 = vmatpush1.bf16.msra.mxu1 %v1858_v14 }
 0x508   :  { %v975_v21 = vpop.f32.mrb[16].mxu0 }
 0x509   :  { %v977_v23 = vpop.f32.mrb[17].mxu0  ;;  %v976_v25 = vadd.f32 %v975_v21, %v854_v20 }
 0x50a   :  { %v979_v24 = vpop.f32.mrb[18].mxu0  ;;  %v2441_v28 = vadd.f32 %v977_v23, %v858_v22 }
 0x50b   :  { %v980_v26 = vadd.f32 %v979_v24, %v854_v20  ;;  %v981_v27 = vpop.f32.mrb[19].mxu0 }
 0x50c   :  { %v2443_v29 = vadd.f32 %v981_v27, %v858_v22 }
 0x50d   :  { %v1014_v30 = vadd.f32 %v980_v26, %v976_v25 }
 0x50e   :  { %v1027_v31 = vadd.f32 %v2443_v29, %v2441_v28 }
 0x510   :  { %v985_v32 = vpop.f32.mrb[20].mxu0 }
 0x511   :  { %v986_v33 = vadd.f32 %v985_v32, %v854_v20  ;;  %v987_v34 = vpop.f32.mrb[21].mxu0 }
 0x512   :  { %v988_v35 = vadd.f32 %v987_v34, %v858_v22  ;;  %v989_v36 = vpop.f32.mrb[22].mxu0 }
 0x513   :  { %v1015_v37 = vadd.f32 %v1014_v30, %v986_v33  ;;  %v990_v38 = vadd.f32 %v989_v36, %v854_v20  ;;  %v991_v39 = vpop.f32.mrb[23].mxu0 }
 0x514   :  { %v1028_v40 = vadd.f32 %v1027_v31, %v988_v35  ;;  %v992_v41 = vadd.f32 %v991_v39, %v858_v22 }
 0x515   :  { %v1016_v42 = vadd.f32 %v1015_v37, %v990_v38 }
 0x516   :  { %v1029_v44 = vadd.f32 %v1028_v40, %v992_v41 }
 0x518   :  { %v995_v43 = vpop.f32.mrb[24].mxu0 }
 0x519   :  { %v996_v45 = vadd.f32 %v995_v43, %v854_v20  ;;  %v997_v46 = vpop.f32.mrb[25].mxu0 }
 0x51a   :  { %v998_v47 = vadd.f32 %v997_v46, %v858_v22  ;;  %v999_v48 = vpop.f32.mrb[26].mxu0 }
 0x51b   :  { %v1017_v49 = vadd.f32 %v1016_v42, %v996_v45  ;;  %v1000_v50 = vadd.f32 %v999_v48, %v854_v20  ;;  %v1001_v51 = vpop.f32.mrb[27].mxu0 }
 0x51c   :  { %v1030_v52 = vadd.f32 %v1029_v44, %v998_v47  ;;  %v1002_v53 = vadd.f32 %v1001_v51, %v858_v22 }
 0x51d   :  { %v1018_v54 = vadd.f32 %v1017_v49, %v1000_v50 }
 0x51e   :  { %v1031_v55 = vadd.f32 %v1030_v52, %v1002_v53 }
 0x520   :  { %v1005_v56 = vpop.f32.mrb[28].mxu0 }
 0x521   :  { %v1006_v8 = vadd.f32 %v1005_v56, %v854_v20  ;;  %v1007_v57 = vpop.f32.mrb[29].mxu0 }
 0x522   :  { %v1008_v58 = vadd.f32 %v1007_v57, %v858_v22  ;;  %v1009_v59 = vpop.f32.mrb[30].mxu0 }
 0x523   :  { %v1019_v60 = vadd.f32 %v1018_v54, %v1006_v8  ;;  %v1010_v61 = vadd.f32 %v1009_v59, %v854_v20  ;;  %v1011_v62 = vpop.f32.mrb[31].mxu0 }
 0x524   :  { %v1032_v63 = vadd.f32 %v1031_v55, %v1008_v58  ;;  %v1012_v0 = vadd.f32 %v1011_v62, %v858_v22 }
 0x525   :  { %v1020_v1 = vadd.f32 %v1019_v60, %v1010_v61 }
 0x526   :  { %v1033_v2 = vadd.f32 %v1032_v63, %v1012_v0 }
 0x527   :  { %v1021_v3 = vrot.slane %v1020_v1, 4 }
 0x528   :  { %v1034_v4 = vrot.slane %v1033_v2, 4 }
 0x529   :  { %v1022_v5 = vadd.f32 %v1021_v3, %v1020_v1 }
 0x52a   :  { %v1035_v6 = vadd.f32 %v1034_v4, %v1033_v2 }
 0x52b   :  { %v1023_v7 = vrot.slane %v1022_v5, 2 }
 0x52c   :  { %v1036_v9 = vrot.slane %v1035_v6, 2 }
 0x52d   :  { %v1024_v10 = vadd.f32 %v1023_v7, %v1022_v5 }
 0x52e   :  { %v1037_v11 = vadd.f32 %v1036_v9, %v1035_v6 }
 0x52f   :  { %v1025_v12 = vrot.slane %v1024_v10, 1 }
 0x530   :  { %v1038_v13 = vrot.slane %v1037_v11, 1 }
 0x531   :  { %v1026_v14 = vadd.f32 %v1025_v12, %v1024_v10 }
 0x532   :  { %v1039_v15 = vadd.f32 %v1038_v13, %v1037_v11 }
 0x533   :  { %v1040_v16 = vmul.f32 0.015625, %v1026_v14 }
 0x534   :  { %v1041_v18 = vmul.f32 0.015625, %v1039_v15 }
 0x535   :  { %v2447_v20 = vsub.f32 %v976_v25, %v1040_v16  ;;  %v2449_v21 = vsub.f32 %v980_v26, %v1040_v16  ;;  %v2451_v22 = vsub.f32 %v986_v33, %v1040_v16  ;;  %v2453_v23 = vsub.f32 %v990_v38, %v1040_v16 }
 0x536   :  { %v2455_v24 = vsub.f32 %v996_v45, %v1040_v16  ;;  %v2457_v27 = vsub.f32 %v1000_v50, %v1040_v16  ;;  %v2459_v30 = vsub.f32 %v1006_v8, %v1040_v16  ;;  %v2461_v31 = vsub.f32 %v1010_v61, %v1040_v16 }
 0x537   :  { %v1058_v32 = vmul.f32 %v2447_v20, %v2447_v20  ;;  %v1060_v25 = vmul.f32 %v2449_v21, %v2449_v21  ;;  %v1062_v26 = vmul.f32 %v2451_v22, %v2451_v22  ;;  %v1064_v33 = vmul.f32 %v2453_v23, %v2453_v23 }
 0x538   :  { %v2472_v36 = vsub.f32 %v2441_v28, %v1041_v18  ;;  %v2475_v37 = vsub.f32 %v2443_v29, %v1041_v18  ;;  %v2477_v38 = vsub.f32 %v988_v35, %v1041_v18  ;;  %v2479_v39 = vsub.f32 %v992_v41, %v1041_v18 }
 0x539   :  { %v1074_v34 = vadd.f32 %v1060_v25, %v1058_v32  ;;  %v2481_v40 = vsub.f32 %v998_v47, %v1041_v18  ;;  %v2483_v42 = vsub.f32 %v1002_v53, %v1041_v18  ;;  %v2485_v44 = vsub.f32 %v1008_v58, %v1041_v18  ;;  %v1122_v32 = vld [vmem:[%s2621_s15] sm:$0x3] }
 0x53a   :  { %v2487_v45 = vsub.f32 %v1012_v0, %v1041_v18  ;;  %v1059_v28 = vmul.f32 %v2472_v36, %v2472_v36  ;;  %v1061_v29 = vmul.f32 %v2475_v37, %v2475_v37  ;;  %v1066_v35 = vmul.f32 %v2455_v24, %v2455_v24  ;;  %v1150_v25 = vld [vmem:[%s2622_s16] sm:$0x3] }
 0x53b   :  { %v1075_v43 = vadd.f32 %v1074_v34, %v1062_v26  ;;  %v1063_v46 = vmul.f32 %v2477_v38, %v2477_v38  ;;  %v1068_v48 = vmul.f32 %v2457_v27, %v2457_v27  ;;  %v1065_v50 = vmul.f32 %v2479_v39, %v2479_v39 }
 0x53c   :  { %v1087_v47 = vadd.f32 %v1061_v29, %v1059_v28  ;;  %v1070_v52 = vmul.f32 %v2459_v30, %v2459_v30  ;;  %v1067_v54 = vmul.f32 %v2481_v40, %v2481_v40  ;;  %v1072_v56 = vmul.f32 %v2461_v31, %v2461_v31 }
 0x53d   :  { %v1076_v41 = vadd.f32 %v1075_v43, %v1064_v33  ;;  %v1069_v57 = vmul.f32 %v2483_v42, %v2483_v42  ;;  %v1071_v60 = vmul.f32 %v2485_v44, %v2485_v44  ;;  %v1073_v63 = vmul.f32 %v2487_v45, %v2487_v45 }
 0x53e   :  { %v1088_v51 = vadd.f32 %v1087_v47, %v1063_v46  ;;  %v1127_v26 = vrot.slane %v1122_v32, %v2432_v17  ;;  %v2521_v34 = vrot.slane %v1122_v32, %v2437_v19  ;;  %v2524_v43 = vrot.slane %v1150_v25, %v2432_v17 }
 0x53f   :  { %v1077_v49 = vadd.f32 %v1076_v41, %v1066_v35  ;;  %v2527_v28 = vrot.slane %v1150_v25, %v2437_v19 }
 0x540   :  { %v1089_v55 = vadd.f32 %v1088_v51, %v1065_v50 }
 0x541   :  { %v1078_v53 = vadd.f32 %v1077_v49, %v1068_v48 }
 0x542   :  { %v1090_v58 = vadd.f32 %v1089_v55, %v1067_v54 }
 0x543   :  { %v1079_v8 = vadd.f32 %v1078_v53, %v1070_v52 }
 0x544   :  { %v1091_v61 = vadd.f32 %v1090_v58, %v1069_v57 }
 0x545   :  { %v1080_v59 = vadd.f32 %v1079_v8, %v1072_v56 }
 0x546   :  { %v1092_v0 = vadd.f32 %v1091_v61, %v1071_v60 }
 0x547   :  { %v1081_v62 = vrot.slane %v1080_v59, 4 }
 0x548   :  { %v1093_v2 = vadd.f32 %v1092_v0, %v1073_v63 }
 0x549   :  { %v1082_v1 = vadd.f32 %v1081_v62, %v1080_v59 }
 0x54a   :  { %v1094_v4 = vrot.slane %v1093_v2, 4 }
 0x54b   :  { %v1083_v3 = vrot.slane %v1082_v1, 2 }
 0x54c   :  { %v1095_v6 = vadd.f32 %v1094_v4, %v1093_v2 }
 0x54d   :  { %v1084_v5 = vadd.f32 %v1083_v3, %v1082_v1 }
 0x54e   :  { %v1096_v9 = vrot.slane %v1095_v6, 2 }
 0x54f   :  { %v1085_v7 = vrot.slane %v1084_v5, 1 }
 0x550   :  { %v1097_v11 = vadd.f32 %v1096_v9, %v1095_v6 }
 0x551   :  { %v1086_v10 = vadd.f32 %v1085_v7, %v1084_v5 }
 0x552   :  { %v1098_v13 = vrot.slane %v1097_v11, 1 }
 0x553   :  { %v1100_v12 = vmul.f32 0.015625, %v1086_v10 }
 0x554   :  { %v1099_v15 = vadd.f32 %v1098_v13, %v1097_v11 }
 0x555   :  { %v1102_v14 = vadd.f32 1e-05, %v1100_v12 }
 0x556   :  { %v1101_v16 = vmul.f32 0.015625, %v1099_v15 }
 0x557   :  { %1867 = vrsqrt.f32 %v1102_v14 }
 0x558   :  { %v1103_v18 = vadd.f32 1e-05, %v1101_v16 }
 0x55a   :  { %1869 = vrsqrt.f32 %v1103_v18 }
 0x561   :  { %v1868_v33 = vpop.eup %1867 }
 0x562   :  { %v1120_v29 = vmul.f32 %v1868_v33, %v2461_v31  ;;  %v1106_v35 = vmul.f32 %v1868_v33, %v2447_v20  ;;  %v1108_v41 = vmul.f32 %v1868_v33, %v2449_v21  ;;  %v1110_v46 = vmul.f32 %v1868_v33, %v2451_v22 }
 0x563   :  { %v1112_v47 = vmul.f32 %v1868_v33, %v2453_v23  ;;  %v1114_v48 = vmul.f32 %v1868_v33, %v2455_v24  ;;  %v1116_v49 = vmul.f32 %v1868_v33, %v2457_v27  ;;  %v1118_v50 = vmul.f32 %v1868_v33, %v2459_v30 }
 0x564   :  { %v1148_v51 = vmul.f32 %v1127_v26, %v1120_v29  ;;  %v1134_v52 = vmul.f32 %v1127_v26, %v1106_v35  ;;  %v1136_v53 = vmul.f32 %v1127_v26, %v1108_v41  ;;  %v1138_v54 = vmul.f32 %v1127_v26, %v1110_v46  ;;  %v1870_v55 = vpop.eup %1869 }
 0x565   :  { %v1140_v31 = vmul.f32 %v1127_v26, %v1112_v47  ;;  %v1142_v56 = vmul.f32 %v1127_v26, %v1114_v48  ;;  %v1144_v20 = vmul.f32 %v1127_v26, %v1116_v49  ;;  %v1146_v8 = vmul.f32 %v1127_v26, %v1118_v50 }
 0x566   :  { %v1121_v21 = vmul.f32 %v1870_v55, %v2487_v45  ;;  %v1107_v22 = vmul.f32 %v1870_v55, %v2472_v36  ;;  %v1109_v23 = vmul.f32 %v1870_v55, %v2475_v37  ;;  %v1162_v24 = vadd.f32 %v2524_v43, %v1134_v52 }
 0x567   :  { %v1164_v27 = vadd.f32 %v2524_v43, %v1136_v53  ;;  %v1111_v30 = vmul.f32 %v1870_v55, %v2477_v38  ;;  %v1113_v57 = vmul.f32 %v1870_v55, %v2479_v39  ;;  %v1166_v58 = vadd.f32 %v2524_v43, %v1138_v54 }
 0x568   :  { %v1149_v59 = vmul.f32 %v2521_v34, %v1121_v21  ;;  %v1135_v60 = vmul.f32 %v2521_v34, %v1107_v22  ;;  %v1137_v45 = vmul.f32 %v2521_v34, %v1109_v23  ;;  %v1178_v61 = vmax.f32 %v1162_v24, 0.0 }
 0x569   :  { %v1180_v36 = vmax.f32 %v1164_v27, 0.0  ;;  %v1139_v37 = vmul.f32 %v2521_v34, %v1111_v30  ;;  %v1141_v62 = vmul.f32 %v2521_v34, %v1113_v57  ;;  %v1168_v63 = vadd.f32 %v2524_v43, %v1140_v31 }
 0x56a   :  { %v1163_v38 = vadd.f32 %v2527_v28, %v1135_v60  ;;  %v1165_v39 = vadd.f32 %v2527_v28, %v1137_v45  ;;  %v1182_v0 = vmax.f32 %v1166_v58, 0.0  ;;  %v1115_v1 = vmul.f32 %v1870_v55, %v2481_v40 }
 0x56b   :  { %v1194_v2 = vpack.c.bf16 %v1180_v36, %v1178_v61  ;;  %v1167_v3 = vadd.f32 %v2527_v28, %v1139_v37  ;;  %v1169_v4 = vadd.f32 %v2527_v28, %v1141_v62  ;;  %v1184_v5 = vmax.f32 %v1168_v63, 0.0 }
 0x56c   :  { %v1179_v6 = vmax.f32 %v1163_v38, 0.0  ;;  %v1181_v7 = vmax.f32 %v1165_v39, 0.0  ;;  %v1117_v9 = vmul.f32 %v1870_v55, %v2483_v42  ;;  %v1143_v10 = vmul.f32 %v2521_v34, %v1115_v1 }
 0x56d   :  { %v1183_v11 = vmax.f32 %v1167_v3, 0.0  ;;  %v1185_v12 = vmax.f32 %v1169_v4, 0.0  ;;  %v1196_v13 = vpack.c.bf16 %v1184_v5, %v1182_v0  ;;  %v1170_v14 = vadd.f32 %v2524_v43, %v1142_v56 }
 0x56e   :  { %v1195_v15 = vpack.c.bf16 %v1181_v7, %v1179_v6  ;;  %v1145_v40 = vmul.f32 %v2521_v34, %v1117_v9  ;;  %v1171_v16 = vadd.f32 %v2527_v28, %v1143_v10  ;;  %v1172_v18 = vadd.f32 %v2524_v43, %v1144_v20 }
 0x56f   :  { %v1197_v32 = vpack.c.bf16 %v1185_v12, %v1183_v11  ;;  %v1186_v25 = vmax.f32 %v1170_v14, 0.0  ;;  %v1119_v26 = vmul.f32 %v1870_v55, %v2485_v44  ;;  %v1177_v42 = vadd.f32 %v2527_v28, %v1149_v59 }
 0x570   :  { %1438 = vmatprep.mubr.bf16.mxu1 %v1195_v15  ;;  %v1173_v33 = vadd.f32 %v2527_v28, %v1145_v40  ;;  %v1187_v29 = vmax.f32 %v1171_v16, 0.0  ;;  %v1188_v35 = vmax.f32 %v1172_v18, 0.0  ;;  %v1174_v41 = vadd.f32 %v2524_v43, %v1146_v8 }
 0x571   :  { %1439 = vmatmul.mubr.bf16.vlgmr.msra.gmra.mrb[8].mxu1 %v1194_v2  ;;  %v1147_v46 = vmul.f32 %v2521_v34, %v1119_v26  ;;  %v1176_v47 = vadd.f32 %v2524_v43, %v1148_v51  ;;  %v1193_v52 = vmax.f32 %v1177_v42, 0.0  ;;  %v1234_v34 = vld [vmem:[%s2624_s18] sm:$0x3]  ;;  %s2133_s18 = smov [#allocation14]  }
 0x572   :  { %1448 = vmatprep.mubr.bf16.mxu1 %v1197_v32  ;;  %v1189_v48 = vmax.f32 %v1173_v33, 0.0  ;;  %v1198_v49 = vpack.c.bf16 %v1188_v35, %v1186_v25  ;;  %v1190_v50 = vmax.f32 %v1174_v41, 0.0  ;;  %v2573_v43 = vrot.slane %v1234_v34, %v2432_v17  ;;  %s1596_s30 = sshll.u32 %s2133_s18, 4  ;;  %s1597_s30 = int_to_ptr.vmem [resolvable:$true] %s1596_s30 }
 0x573   :  { %v1175_v44 = vadd.f32 %v2527_v28, %v1147_v46  ;;  %v1192_v53 = vmax.f32 %v1176_v47, 0.0  ;;  %v2576_v28 = vrot.slane %v1234_v34, %v2437_v19  ;;  %s2089_s27 = scalar_lea.vmem %s1597_s30, 2048  ;;  %p2094_p1 = scmp.lt.s32.totalorder %s1597_s30, %s1597_s30 }
 0x574   :  { %v1199_v54 = vpack.c.bf16 %v1189_v48, %v1187_v29  ;;  %p2090_p0 = scmp.ne.s32.totalorder %s1597_s30, %s2089_s27  ;;  %p2095_p2 = scmp.lt.s32.totalorder %s2089_s27, %s2089_s27 }
 0x575   :  { %v1191_v55 = vmax.f32 %v1175_v44, 0.0  ;;  %v1200_v31 = vpack.c.bf16 %v1192_v53, %v1190_v50 }
 0x576   :  { %p2096_p3 = por %p2095_p2, %p2094_p1 }
 0x577   :  { %v1201_v56 = vpack.c.bf16 %v1193_v52, %v1191_v55 }
 0x578   :  { %p2097_p4 = pnand %p2096_p3, %p2090_p0 }
 0x579   :  { %1449 = vmatmul.mubr.bf16.gmra.mrb[12].mxu1 %v1196_v13 }
 0x57a   :  { %1458 = vmatprep.mubr.bf16.mxu1 %v1199_v54 }
 0x581   :  { %1459 = vmatmul.mubr.bf16.gmra.mrb[16].mxu1 %v1198_v49 }
 0x582   :  { %1468 = vmatprep.mubr.bf16.mxu1 %v1201_v56 }
 0x589   :  { %1469 = vmatmul.mubr.bf16.gmra.mrb[20].mxu1 %v1200_v31 }
 0x644   :  { %v1440_v51 = vpop.f32.mrb[8].mxu1 }
 0x645   :  { %v1441_v20 = vadd.f32 %v1440_v51, %v2573_v43  ;;  %v1442_v8 = vpop.f32.mrb[9].mxu1 }
 0x646   :  { %v1443_v21 = vadd.f32 %v1442_v8, %v2576_v28  ;;  %v1444_v22 = vpop.f32.mrb[10].mxu1 }
 0x647   :  { %v1479_v23 = vsub.f32 0.0, %v1441_v20  ;;  %v1445_v24 = vadd.f32 %v1444_v22, %v2573_v43  ;;  %v1446_v27 = vpop.f32.mrb[11].mxu1 }
 0x648   :  { %v1480_v30 = vsub.f32 0.0, %v1443_v21  ;;  %v1447_v57 = vadd.f32 %v1446_v27, %v2576_v28 }
 0x649   :  { %v1495_v58 = vmul.f32 1.442695, %v1479_v23  ;;  %v1481_v17 = vsub.f32 0.0, %v1445_v24 }
 0x64a   :  { %v1497_v59 = vmul.f32 1.442695, %v1480_v30  ;;  %v1482_v60 = vsub.f32 0.0, %v1447_v57 }
 0x64b   :  { %1871 = vpow2.f32 %v1495_v58  ;;  %v1499_v19 = vmul.f32 1.442695, %v1481_v17 }
 0x64c   :  { %1873 = vpow2.f32 %v1497_v59  ;;  %v1501_v45 = vmul.f32 1.442695, %v1482_v60  ;;  %v1450_v61 = vpop.f32.mrb[12].mxu1 }
 0x64d   :  { %1875 = vpow2.f32 %v1499_v19  ;;  %v1451_v36 = vadd.f32 %v1450_v61, %v2573_v43  ;;  %v1452_v37 = vpop.f32.mrb[13].mxu1 }
 0x64e   :  { %1877 = vpow2.f32 %v1501_v45  ;;  %v1453_v62 = vadd.f32 %v1452_v37, %v2576_v28  ;;  %v1454_v63 = vpop.f32.mrb[14].mxu1 }
 0x64f   :  { %v1483_v38 = vsub.f32 0.0, %v1451_v36  ;;  %v1455_v39 = vadd.f32 %v1454_v63, %v2573_v43  ;;  %v1456_v0 = vpop.f32.mrb[15].mxu1 }
 0x650   :  { %v1484_v1 = vsub.f32 0.0, %v1453_v62  ;;  %v1457_v2 = vadd.f32 %v1456_v0, %v2576_v28 }
 0x651   :  { %v1503_v3 = vmul.f32 1.442695, %v1483_v38  ;;  %v1485_v4 = vsub.f32 0.0, %v1455_v39 }
 0x652   :  { %v1505_v5 = vmul.f32 1.442695, %v1484_v1  ;;  %v1486_v6 = vsub.f32 0.0, %v1457_v2 }
 0x653   :  { %1879 = vpow2.f32 %v1503_v3  ;;  %v1507_v7 = vmul.f32 1.442695, %v1485_v4 }
 0x654   :  { %1881 = vpow2.f32 %v1505_v5  ;;  %v1509_v9 = vmul.f32 1.442695, %v1486_v6  ;;  %v1460_v10 = vpop.f32.mrb[16].mxu1 }
 0x655   :  { %v1872_v11 = vpop.eup %1871  ;;  %1883 = vpow2.f32 %v1507_v7  ;;  %v1461_v12 = vadd.f32 %v1460_v10, %v2573_v43  ;;  %v1462_v13 = vpop.f32.mrb[17].mxu1 }
 0x656   :  { %v1874_v14 = vpop.eup %1873  ;;  %v1527_v15 = vadd.f32 1.0, %v1872_v11  ;;  %1885 = vpow2.f32 %v1509_v9  ;;  %v1463_v40 = vadd.f32 %v1462_v13, %v2576_v28  ;;  %v1464_v16 = vpop.f32.mrb[18].mxu1 }
 0x657   :  { %v1876_v18 = vpop.eup %1875  ;;  %v1528_v32 = vadd.f32 1.0, %v1874_v14  ;;  %v1487_v25 = vsub.f32 0.0, %v1461_v12  ;;  %v1465_v26 = vadd.f32 %v1464_v16, %v2573_v43  ;;  %v1466_v42 = vpop.f32.mrb[19].mxu1 }
 0x658   :  { %v1878_v33 = vpop.eup %1877  ;;  %1887 = vrcp.f32 %v1527_v15  ;;  %v1529_v29 = vadd.f32 1.0, %v1876_v18  ;;  %v1488_v35 = vsub.f32 0.0, %v1463_v40  ;;  %v1467_v41 = vadd.f32 %v1466_v42, %v2576_v28 }
 0x659   :  { %1889 = vrcp.f32 %v1528_v32  ;;  %v1530_v46 = vadd.f32 1.0, %v1878_v33  ;;  %v1511_v47 = vmul.f32 1.442695, %v1487_v25  ;;  %v1489_v48 = vsub.f32 0.0, %v1465_v26 }
 0x65a   :  { %1891 = vrcp.f32 %v1529_v29  ;;  %v1513_v49 = vmul.f32 1.442695, %v1488_v35  ;;  %v1490_v50 = vsub.f32 0.0, %v1467_v41 }
 0x65b   :  { %1893 = vrcp.f32 %v1530_v46  ;;  %v1515_v44 = vmul.f32 1.442695, %v1489_v48 }
 0x65c   :  { %1895 = vpow2.f32 %v1511_v47  ;;  %v1517_v52 = vmul.f32 1.442695, %v1490_v50  ;;  %v1470_v53 = vpop.f32.mrb[20].mxu1 }
 0x65d   :  { %v1880_v54 = vpop.eup %1879  ;;  %1897 = vpow2.f32 %v1513_v49  ;;  %v1471_v55 = vadd.f32 %v1470_v53, %v2573_v43  ;;  %v1472_v31 = vpop.f32.mrb[21].mxu1 }
 0x65e   :  { %v1882_v56 = vpop.eup %1881  ;;  %v1531_v34 = vadd.f32 1.0, %v1880_v54  ;;  %1899 = vpow2.f32 %v1515_v44  ;;  %v1473_v51 = vadd.f32 %v1472_v31, %v2576_v28  ;;  %v1474_v20 = vpop.f32.mrb[22].mxu1 }
 0x65f   :  { %v1884_v8 = vpop.eup %1883  ;;  %v1532_v21 = vadd.f32 1.0, %v1882_v56  ;;  %1901 = vpow2.f32 %v1517_v52  ;;  %v1491_v22 = vsub.f32 0.0, %v1471_v55  ;;  %v1475_v23 = vadd.f32 %v1474_v20, %v2573_v43  ;;  %v1476_v24 = vpop.f32.mrb[23].mxu1 }
 0x660   :  { %v1886_v27 = vpop.eup %1885  ;;  %1903 = vrcp.f32 %v1531_v34  ;;  %v1533_v30 = vadd.f32 1.0, %v1884_v8  ;;  %v1492_v57 = vsub.f32 0.0, %v1473_v51  ;;  %v1477_v58 = vadd.f32 %v1476_v24, %v2576_v28 }
 0x661   :  { %1905 = vrcp.f32 %v1532_v21  ;;  %v1534_v17 = vadd.f32 1.0, %v1886_v27  ;;  %v1519_v59 = vmul.f32 1.442695, %v1491_v22  ;;  %v1493_v60 = vsub.f32 0.0, %v1475_v23 }
 0x662   :  { %v1888_v19 = vpop.eup %1887  ;;  %1907 = vrcp.f32 %v1533_v30  ;;  %v1521_v45 = vmul.f32 1.442695, %v1492_v57  ;;  %v1494_v61 = vsub.f32 0.0, %v1477_v58 }
 0x663   :  { %v1890_v36 = vpop.eup %1889  ;;  %1575 = vst [vmem:[#allocation14] sm:$0xff] %v1888_v19  ;;  %1909 = vrcp.f32 %v1534_v17  ;;  %v1523_v37 = vmul.f32 1.442695, %v1493_v60 }
 0x664   :  { %v1892_v43 = vpop.eup %1891  ;;  %1576 = vst [vmem:[#allocation14 + $0x8] sm:$0xff] %v1890_v36  ;;  %1911 = vpow2.f32 %v1519_v59  ;;  %v1525_v62 = vmul.f32 1.442695, %v1494_v61 }
 0x665   :  { %v1894_v63 = vpop.eup %1893  ;;  %1577 = vst [vmem:[#allocation14 + $0x10] sm:$0xff] %v1892_v43  ;;  %1913 = vpow2.f32 %v1521_v45 }
 0x666   :  { %v1896_v28 = vpop.eup %1895  ;;  %1578 = vst [vmem:[#allocation14 + $0x18] sm:$0xff] %v1894_v63  ;;  %1915 = vpow2.f32 %v1523_v37 }
 0x667   :  { %v1898_v38 = vpop.eup %1897  ;;  %v1535_v39 = vadd.f32 1.0, %v1896_v28  ;;  %1917 = vpow2.f32 %v1525_v62 }
 0x668   :  { %v1900_v0 = vpop.eup %1899  ;;  %v1536_v1 = vadd.f32 1.0, %v1898_v38 }
 0x669   :  { %v1902_v2 = vpop.eup %1901  ;;  %1919 = vrcp.f32 %v1535_v39  ;;  %v1537_v3 = vadd.f32 1.0, %v1900_v0 }
 0x66a   :  { %v1904_v4 = vpop.eup %1903  ;;  %1921 = vrcp.f32 %v1536_v1  ;;  %v1538_v5 = vadd.f32 1.0, %v1902_v2 }
 0x66b   :  { %v1906_v6 = vpop.eup %1905  ;;  %1579 = vst [vmem:[#allocation14 + $0x20] sm:$0xff] %v1904_v4  ;;  %1923 = vrcp.f32 %v1537_v3 }
 0x66c   :  { %v1908_v7 = vpop.eup %1907  ;;  %1580 = vst [vmem:[#allocation14 + $0x28] sm:$0xff] %v1906_v6  ;;  %1925 = vrcp.f32 %v1538_v5 }
 0x66d   :  { %v1910_v9 = vpop.eup %1909  ;;  %1581 = vst [vmem:[#allocation14 + $0x30] sm:$0xff] %v1908_v7 }
 0x66e   :  { %v1912_v10 = vpop.eup %1911  ;;  %1582 = vst [vmem:[#allocation14 + $0x38] sm:$0xff] %v1910_v9 }
 0x66f   :  { %v1914_v11 = vpop.eup %1913  ;;  %v1539_v12 = vadd.f32 1.0, %v1912_v10 }
 0x670   :  { %v1916_v13 = vpop.eup %1915  ;;  %v1540_v14 = vadd.f32 1.0, %v1914_v11 }
 0x671   :  { %v1918_v15 = vpop.eup %1917  ;;  %1927 = vrcp.f32 %v1539_v12  ;;  %v1541_v40 = vadd.f32 1.0, %v1916_v13 }
 0x672   :  { %1929 = vrcp.f32 %v1540_v14  ;;  %v1542_v16 = vadd.f32 1.0, %v1918_v15 }
 0x673   :  { %v1920_v18 = vpop.eup %1919  ;;  %1931 = vrcp.f32 %v1541_v40 }
 0x674   :  { %v1922_v32 = vpop.eup %1921  ;;  %1583 = vst [vmem:[#allocation14 + $0x40] sm:$0xff] %v1920_v18  ;;  %1933 = vrcp.f32 %v1542_v16 }
 0x675   :  { %v1924_v25 = vpop.eup %1923  ;;  %1584 = vst [vmem:[#allocation14 + $0x48] sm:$0xff] %v1922_v32 }
 0x676   :  { %v1926_v26 = vpop.eup %1925  ;;  %1585 = vst [vmem:[#allocation14 + $0x50] sm:$0xff] %v1924_v25 }
 0x677   :  { %1586 = vst [vmem:[#allocation14 + $0x58] sm:$0xff] %v1926_v26 }
 0x67b   :  { %v1928_v42 = vpop.eup %1927 }
 0x67c   :  { %v1930_v33 = vpop.eup %1929  ;;  %1587 = vst [vmem:[#allocation14 + $0x60] sm:$0xff] %v1928_v42 }
 0x67d   :  { %v1932_v29 = vpop.eup %1931  ;;  %1588 = vst [vmem:[#allocation14 + $0x68] sm:$0xff] %v1930_v33 }
 0x67e   :  { %v1934_v35 = vpop.eup %1933  ;;  %1589 = vst [vmem:[#allocation14 + $0x70] sm:$0xff] %v1932_v29 }
 0x67f   :  { %1590 = vst [vmem:[#allocation14 + $0x78] sm:$0xff] %v1934_v35 }
 0x680   :  { %2100 = shalt.err (!%p2097_p4)
}
 0x681   :  { %s2640_s1 = sld [smem:[#allocation24_spill]] }
 0x687   :  { %s2101_s6 = scalar_lea.hbm %s2640_s1, 2048 }
 0x688   :  { %p2102_p5 = scmp.ne.s32.totalorder %s2640_s1, %s2101_s6  ;;  %p2105_p6 = scmp.lt.u32.totalorder %s2101_s6, %s2640_s1 }
 0x68a   :  { %p2107_p7 = pnand %p2105_p6, %p2102_p5 }
 0x68c   :  { %2110 = shalt.err (!%p2107_p7)
}
 0x68d   :  { %s2134_s4 = smov 256   ;;  %s2135_s20 = smov 16  }
 0x68e   :  { %1602 = dma.vmem_to_hbm [thread:$0]  %s1597_s30, 2048, %s2640_s1, [#allocation4], %s2134_s4, %s2134_s4, %s2135_s20  }
 0x68f   :  { %2119 = dma.done.wait [#allocation4], 2048  }
 0x690   :  { %2120 = vsyncadd [#allocation4], 4294965248 }
 0x691   :  { %1606 = vsyncpa [#allocation3], 1 }
 0x692   :  { %1607 = vsyncpa [#allocation6], 1 }
 0x693   :  { %1608 = vsyncpa [#allocation9], 1 }
 0x694   :  { %1609 = vsyncpa [#allocation12], 1 }
 0x695   :  { %1610 = vsyncpa [#allocation4], 1 }

</bundles_post_ra>
